<compile_context>
chip_gen: v7x
topology: tpu7x:2x2x1
jax: 0.10.0
libtpu: 0.0.40
codegen_flags: <defaults>
</compile_context>

<pallas_src>
import math
import functools

import jax
import jax.numpy as jnp
from jax import lax
from jax.experimental import pallas as pl
from jax.experimental.pallas import tpu as pltpu

NUM_HEADS = 8


def _round_up(x, m):
    return (x + m - 1) // m * m


def _layer_norm(x, g, b, eps=1e-5):
    mu = jnp.mean(x, axis=-1, keepdims=True)
    var = jnp.mean((x - mu) ** 2, axis=-1, keepdims=True)
    return (x - mu) * lax.rsqrt(var + eps) * g + b


def _pack_matrices(named):
    """Pack a list of (name, 2-D array) into one (rows, >=128) f32 slab."""
    width = _round_up(max(m.shape[1] for _, m in named), 128)
    layout, blocks, row = {}, [], 0
    for name, m in named:
        r, c = m.shape
        rp = _round_up(r, 8)
        layout[name] = (row, r, c)
        blk = jnp.zeros((rp, width), jnp.float32).at[:r, :c].set(
            m.astype(jnp.float32))
        blocks.append(blk)
        row += rp
    return jnp.concatenate(blocks, axis=0), layout


def _pack_vectors(named):
    """Pack a list of (name, 1-D/(1,n) array) into one (rows, >=128) slab."""
    width = _round_up(max(v.shape[-1] for _, v in named), 128)
    rows = _round_up(len(named), 8)
    slab = jnp.zeros((rows, width), jnp.float32)
    layout = {}
    for i, (name, v) in enumerate(named):
        c = v.shape[-1]
        layout[name] = (i, c)
        slab = slab.at[i, :c].set(v.reshape(-1).astype(jnp.float32))
    return slab, layout


def _map_enc_kernel(mat_layout, vec_layout, P, H, d_k,
                    pts_ref, w_ref, vecs_ref, out_ref):
    f32 = jnp.float32

    def mat(name):
        r0, r, c = mat_layout[name]
        return w_ref[r0:r0 + r, :c]

    def vec(name):
        row, c = vec_layout[name]
        return vecs_ref[row:row + 1, :c]

    t_bm, t_s, PC = pts_ref.shape
    n = t_bm * t_s
    pts = pts_ref[...].reshape(n, PC)            # segment-major point rows

    # Point-Linear folded into V / per-head scores / flag extraction: three
    # lane-dense matmuls against block-diagonal fused weights (flag lane of
    # each point hits a zero weight row, so no wrapper-side slicing).
    v = jnp.dot(pts, mat("w_v"), preferred_element_type=f32) + vec("b_v")        # (n, P*d_k)
    scores = jnp.dot(pts, mat("w_sc"), preferred_element_type=f32) + vec("b_sc")  # (n, P*H)
    flags = jnp.dot(pts, mat("f_sel"), preferred_element_type=f32)               # (n, P)

    # key_padding_mask (True = masked), with the "un-mask point 0 of a fully
    # empty segment" fix of the reference module (done exactly: the mask row
    # itself is zeroed before the -1e30 penalty matmul).
    masked = (flags != 1.0).astype(f32)                                           # (n, P)
    all_m = (jnp.sum(masked, axis=-1, keepdims=True) >= float(P)).astype(f32)     # (n, 1)
    masked = masked - all_m * vec("p0")
    scores = scores + jnp.dot(masked, mat("e_neg"), preferred_element_type=f32)   # -1e30 on masked pts

    # Per-head max over the P points (groups of H lanes).  P is a power of two
    # in practice -> cyclic lane rolls on the otherwise idle XLU; otherwise
    # fall back to a reshape-based reduction.
    if P & (P - 1) == 0:
        m = scores
        sh = H
        while sh < P * H:
            m = jnp.maximum(m, pltpu.roll(m, sh, axis=1))
            sh *= 2
    else:
        m3 = jnp.max(scores.reshape(n, P, H), axis=1, keepdims=True)
        m = jnp.broadcast_to(m3, (n, P, H)).reshape(n, P * H)

    e = jnp.exp(scores - m)                                                       # (n, P*H), EUP

    # Softmax denominator / numerator, broadcast to d_k lanes via 0/1 matmuls.
    den = jnp.dot(e, mat("d_sum"), preferred_element_type=f32)                    # (n, d_k)
    e_full = jnp.dot(e, mat("g_bd"), preferred_element_type=f32)                  # (n, P*d_k)
    num = jnp.dot(e_full * v, mat("r_sum"), preferred_element_type=f32)           # (n, d_k)

    inv = pl.reciprocal(den, approx=True)        # EUP (den >= 1 after max-subtraction)
    inv = inv * (2.0 - den * inv)                # one Newton step -> f32-level accuracy
    att = num * inv

    # Attention out-proj + norm1.
    o = jnp.dot(att, mat("w_o"), preferred_element_type=f32) + vec("b_o")
    x = _layer_norm(o, vec("ln1_g"), vec("ln1_b"))

    # map_feats FFN + residual (TODO(synk): dropout omitted -> eval semantics).
    h1 = jnp.maximum(
        jnp.dot(x, mat("w1"), preferred_element_type=f32) + vec("b1"), 0.0)
    y = jnp.dot(h1, mat("w2"), preferred_element_type=f32) + vec("b2")
    res = _layer_norm(x + y, vec("ln2_g"), vec("ln2_b"))                          # (n, d_k), bm-major rows

    # s-major, lane-packed store: out[s, bm*d_k:(bm+1)*d_k] = res[bm, s, :]
    # (t_bm is small by construction, so this is a handful of dense VMEM copies;
    #  the HBM write of the whole block stays 128-lane dense).
    res3 = res.reshape(t_bm, t_s, d_k)
    for bm in range(t_bm):
        out_ref[:, bm * d_k:(bm + 1) * d_k] = res3[bm]


def map_encoder_pts_ma(roads, agents_emb, params, *, seg_target=1024, t_bm_max=8):
    """Pallas implementation of MapEncoderPtsMA.forward (eval mode).

    roads:      (B, M, S, P, map_attr + 1) float32
    agents_emb: unused (the reference forward ignores it too).
    Returns (road_seg_emb (S, B, M, d_k), road_segment_mask (B, M, S)).

    seg_target ~ segments per grid step (t_bm * t_s).  1024 is a good default
    on v5e/v6e (128 MiB VMEM); on v7x (64 MiB VMEM, 2 TensorCores) 512-1024 is
    fine as long as (B*M/t_bm)*(S/t_s) leaves several grid steps per core.
    """
    del agents_emb  # unused by the reference forward as well
    B, M, S, P, C = roads.shape
    A = C - 1
    BM = B * M
    d_k = params["w_lin"].shape[1]
    H = NUM_HEADS
    assert d_k % H == 0, "d_k must be divisible by the 8 attention heads"
    hd = d_k // H

    # Segment-major point rows: free, contiguous reshape (no copy, no padding).
    roads_v = roads.astype(jnp.float32).reshape(BM, S, P * C)

    # road_segment_mask (tiny boolean bookkeeping, plain JAX).
    flags5 = roads[..., -1]
    seg_mask = jnp.sum(flags5, axis=3) == 0                         # (B, M, S)
    all_seg = jnp.all(seg_mask, axis=-1)                            # (B, M)
    seg_mask = seg_mask.at[:, :, 0].set(
        jnp.where(all_seg, False, seg_mask[:, :, 0]))

    # ---- constant fusion (once per call, negligible) ------------------------
    w_k_f = params["w_lin"] @ params["w_k"]                         # (A, d_k)
    b_k_f = params["b_lin"] @ params["w_k"] + params["b_k"]         # (1, d_k)
    w_v_f = params["w_lin"] @ params["w_v"]                         # (A, d_k)
    b_v_f = params["b_lin"] @ params["w_v"] + params["b_v"]         # (1, d_k)

    scale = 1.0 / math.sqrt(hd)
    group = (jnp.arange(d_k)[:, None] // hd
             == jnp.arange(H)[None, :]).astype(jnp.float32)         # (d_k, H)
    w_s = group * (params["q_vec"][0][:, None] * scale)             # (d_k, H)  seed query folded in
    w_sc_f = w_k_f @ w_s                                            # (A, H)
    b_sc_f = b_k_f @ w_s                                            # (1, H)

    def with_zero_flag_row(mtx):                                    # (A, n) -> (C, n)
        return jnp.concatenate(
            [mtx, jnp.zeros((1, mtx.shape[1]), jnp.float32)], axis=0)

    eye_p = jnp.eye(P, dtype=jnp.float32)
    w_v_bd = jnp.kron(eye_p, with_zero_flag_row(w_v_f))             # (P*C, P*d_k)
    w_sc_bd = jnp.kron(eye_p, with_zero_flag_row(w_sc_f))           # (P*C, P*H)
    f_sel = jnp.kron(
        eye_p, jnp.zeros((C, 1), jnp.float32).at[A, 0].set(1.0))    # (P*C, P)
    e_neg = jnp.kron(eye_p, jnp.full((1, H), -1e30, jnp.float32))   # (P, P*H)
    g_bd = jnp.kron(eye_p, group.T)                                 # (P*H, P*d_k)
    d_sum = jnp.tile(group.T, (P, 1))                               # (P*H, d_k)
    r_sum = jnp.tile(jnp.eye(d_k, dtype=jnp.float32), (P, 1))       # (P*d_k, d_k)

    b_v_bd = jnp.tile(b_v_f.astype(jnp.float32), (1, P))            # (1, P*d_k)
    b_sc_bd = jnp.tile(b_sc_f.astype(jnp.float32), (1, P))          # (1, P*H)
    p0 = jnp.zeros((1, P), jnp.float32).at[0, 0].set(1.0)

    w_slab, mat_layout = _pack_matrices([
        ("w_v", w_v_bd), ("w_sc", w_sc_bd), ("f_sel", f_sel), ("e_neg", e_neg),
        ("g_bd", g_bd), ("d_sum", d_sum), ("r_sum", r_sum),
        ("w_o", params["w_o"]), ("w1", params["w1"]), ("w2", params["w2"])])

    v_slab, vec_layout = _pack_vectors([
        ("b_v", b_v_bd), ("b_sc", b_sc_bd), ("p0", p0),
        ("b_o", params["b_o"]),
        ("ln1_g", params["ln1_g"]), ("ln1_b", params["ln1_b"]),
        ("b1", params["b1"]), ("b2", params["b2"]),
        ("ln2_g", params["ln2_g"]), ("ln2_b", params["ln2_b"])])

    # ---- tile sizes ----------------------------------------------------------
    # t_bm is small: the in-kernel s-major reorder is t_bm dense (t_s, d_k)
    # copies.  Unless it spans all of B*M, t_bm*d_k must be a multiple of 128.
    align = 128 // math.gcd(d_k, 128)
    t_bm = ((max(t_bm_max, align) + align - 1) // align) * align
    if t_bm >= BM:
        t_bm = BM
    t_s_target = max(8, seg_target // max(t_bm, 1))
    if S <= t_s_target:
        t_s = S
    else:
        t_s = max(8, (t_s_target // 8) * 8)

    grid = (pl.cdiv(BM, t_bm), pl.cdiv(S, t_s))

    # VMEM budget derived from actual tile sizes (v7x has only 64 MiB per TC).
    blk_in = t_bm * t_s * P * C * 4
    blk_out = t_s * t_bm * d_k * 4
    const_bytes = (w_slab.size + v_slab.size) * 4
    live_est = 10 * t_bm * t_s * max(P * d_k, 4 * d_k) * 4
    vmem_limit = int(min(
        56 << 20,
        max(24 << 20, 2 * (2 * (blk_in + blk_out) + const_bytes + live_est))))

    kernel = functools.partial(_map_enc_kernel, mat_layout, vec_layout, P, H, d_k)

    out = pl.pallas_call(
        kernel,
        out_shape=jax.ShapeDtypeStruct((S, BM * d_k), jnp.float32),
        grid=grid,
        in_specs=[
            pl.BlockSpec((t_bm, t_s, P * C), lambda i, j: (i, j, 0)),  # segment rows
            pl.BlockSpec(w_slab.shape, lambda i, j: (0, 0)),           # fused matrices (resident)
            pl.BlockSpec(v_slab.shape, lambda i, j: (0, 0)),           # fused vectors (resident)
        ],
        out_specs=pl.BlockSpec((t_s, t_bm * d_k), lambda i, j: (j, i)),
        compiler_params=pltpu.CompilerParams(
            dimension_semantics=("parallel", "parallel"),
            vmem_limit_bytes=vmem_limit),
    )(roads_v, w_slab, v_slab)

    road_seg_emb = out.reshape(S, B, M, d_k)      # free reshape, already s-major
    return road_seg_emb, seg_mask


# ---------------------------------------------------------------------------
# Deterministic parameter construction (shapes follow the module __init__).
# ---------------------------------------------------------------------------
def make_params(key, d_k=32, map_attr=3):
    ks = jax.random.split(key, 16)

    def xav(k, shape, gain=1.0):
        fan_out, fan_in = shape
        std = gain * math.sqrt(2.0 / (fan_in + fan_out))
        return (std * jax.random.normal(k, shape)).astype(jnp.float32)

    def small(k, shape):
        return (0.1 * jax.random.normal(k, shape)).astype(jnp.float32)

    map_seeds = xav(ks[0], (1, d_k))                               # (1,1,d_k) squeezed
    w_lin_pt = xav(ks[1], (d_k, map_attr), math.sqrt(2.0))         # Linear(map_attr,d_k)
    in_proj_w = xav(ks[2], (3 * d_k, d_k))                         # MHA in_proj
    in_proj_b = small(ks[3], (3 * d_k,))
    w_o_pt = xav(ks[4], (d_k, d_k))                                # MHA out_proj
    w1_pt = xav(ks[5], (3 * d_k, d_k), math.sqrt(2.0))             # map_feats[0]
    w2_pt = xav(ks[6], (d_k, 3 * d_k), math.sqrt(2.0))             # map_feats[3]

    wq, wk, wv = in_proj_w[:d_k], in_proj_w[d_k:2 * d_k], in_proj_w[2 * d_k:]
    bq, bk, bv = in_proj_b[:d_k], in_proj_b[d_k:2 * d_k], in_proj_b[2 * d_k:]

    # The query is the same learned seed for every segment -> project once.
    q_vec = map_seeds @ wq.T + bq                                   # (1, d_k)

    return dict(
        w_lin=w_lin_pt.T, b_lin=small(ks[7], (1, d_k)),
        q_vec=q_vec,
        w_k=wk.T, b_k=bk[None, :],
        w_v=wv.T, b_v=bv[None, :],
        w_o=w_o_pt.T, b_o=small(ks[8], (1, d_k)),
        ln1_g=1.0 + small(ks[9], (1, d_k)), ln1_b=small(ks[10], (1, d_k)),
        w1=w1_pt.T, b1=small(ks[11], (1, 3 * d_k)),
        w2=w2_pt.T, b2=small(ks[12], (1, d_k)),
        ln2_g=1.0 + small(ks[13], (1, d_k)), ln2_b=small(ks[14], (1, d_k)),
    )


# ---------------------------------------------------------------------------
# Pure-JAX reference (mirrors the PyTorch forward) for validation.
# ---------------------------------------------------------------------------
def reference_forward(roads, params):
    B, M, S, P, C = roads.shape
    A = C - 1
    N = B * M * S
    d_k = params["w_lin"].shape[1]
    H, hd = NUM_HEADS, params["w_lin"].shape[1] // NUM_HEADS

    pts = roads[..., :A].reshape(N, P, A)
    flags = roads[..., -1].reshape(N, P)

    feats = pts @ params["w_lin"] + params["b_lin"][0]
    k = feats @ params["w_k"] + params["b_k"][0]
    v = feats @ params["w_v"] + params["b_v"][0]
    q = params["q_vec"][0]

    scores = jnp.einsum("nphd,hd->nph",
                        k.reshape(N, P, H, hd),
                        q.reshape(H, hd)) / math.sqrt(hd)
    masked = (1.0 - flags) != 0
    all_m = jnp.all(masked, axis=-1)
    masked = masked.at[:, 0].set(jnp.where(all_m, False, masked[:, 0]))
    scores = jnp.where(masked[:, :, None], -jnp.inf, scores)
    attn = jax.nn.softmax(scores, axis=1)
    o = jnp.einsum("nph,nphd->nhd", attn,
                   v.reshape(N, P, H, hd)).reshape(N, d_k)
    o = o @ params["w_o"] + params["b_o"][0]

    def ln(x, g, b):
        mu = x.mean(-1, keepdims=True)
        var = ((x - mu) ** 2).mean(-1, keepdims=True)
        return (x - mu) / jnp.sqrt(var + 1e-5) * g + b

    x = ln(o, params["ln1_g"][0], params["ln1_b"][0])
    h1 = jax.nn.relu(x @ params["w1"] + params["b1"][0])
    y = h1 @ params["w2"] + params["b2"][0]
    out = ln(x + y, params["ln2_g"][0], params["ln2_b"][0])
    emb = out.reshape(B, M, S, d_k).transpose(2, 0, 1, 3)

    seg_mask = jnp.sum(roads[..., -1], axis=3) == 0
    all_seg = jnp.all(seg_mask, axis=-1)
    seg_mask = seg_mask.at[:, :, 0].set(
        jnp.where(all_seg, False, seg_mask[:, :, 0]))
    return emb, seg_mask


if __name__ == "__main__":
    key = jax.random.PRNGKey(0)

    def run_case(case_key, B, M, S, P, d_k=32, map_attr=3, **kw):
        kp, kc, kf = jax.random.split(case_key, 3)
        params = make_params(kp, d_k=d_k, map_attr=map_attr)

        coords = jax.random.normal(kc, (B, M, S, P, map_attr), jnp.float32)
        exist = jax.random.bernoulli(kf, 0.7,
                                     (B, M, S, P, 1)).astype(jnp.float32)
        exist = exist.at[0, 0, 0].set(0.0)        # fully-empty segment (mask fix)
        exist = exist.at[B - 1, M - 1].set(0.0)   # fully-empty road    (mask fix)
        roads = jnp.concatenate([coords * exist, exist], axis=-1)

        agents_emb = jax.random.normal(jax.random.PRNGKey(1), (4, B, d_k),
                                       jnp.float32)  # unused by forward

        emb, seg_mask = map_encoder_pts_ma(roads, agents_emb, params, **kw)
        jax.block_until_ready(emb)

        emb_ref, seg_ref = reference_forward(roads, params)
        assert emb.shape == (S, B, M, d_k)
        assert seg_mask.shape == (B, M, S)
        err = float(jnp.max(jnp.abs(emb - emb_ref)))
        assert jnp.allclose(emb, emb_ref, atol=2e-3, rtol=2e-3), err
        assert bool(jnp.all(seg_mask == seg_ref))

    k1, k2, k3, k4 = jax.random.split(key, 4)
    run_case(k1, B=2, M=3, S=4, P=8)                    # single block, B*M < bm tile
    run_case(k2, B=1, M=2, S=3, P=16)                   # tiny shapes, P=16 (128-lane scores)
    run_case(k3, B=3, M=5, S=4, P=8)                    # partial B*M tile (masked tail)
    run_case(k4, B=1, M=9, S=12, P=8, seg_target=32)    # partial tiles on both grid axes
    print("KERNEL_OK")
</pallas_src>

<mosaic_0001>
module attributes {stable_mosaic.version = 11 : i64} {
  func.func @_map_enc_kernel(%arg0: i32, %arg1: i32, %arg2: memref<6x4x32xf32, #tpu.memory_space<vmem>>, %arg3: memref<648x256xf32, #tpu.memory_space<vmem>>, %arg4: memref<16x256xf32, #tpu.memory_space<vmem>>, %arg5: memref<4x192xf32, #tpu.memory_space<vmem>>) attributes {dimension_semantics = [#tpu.dimension_semantics<parallel>, #tpu.dimension_semantics<parallel>], iteration_bounds = array<i64: 1, 1>, scalar_prefetch = 0 : i64, scratch_operands = 0 : i64, tpu.core_type = #tpu.core_type<tc>, window_params = [{transform_indices = @transform_0, window_bounds = array<i64: 6, 4, 32>}, {pipeline_mode = #tpu.pipeline_mode<synchronous>, transform_indices = @transform_1, window_bounds = array<i64: 648, 256>}, {pipeline_mode = #tpu.pipeline_mode<synchronous>, transform_indices = @transform_2, window_bounds = array<i64: 16, 256>}, {transform_indices = @transform_3, window_bounds = array<i64: 4, 192>}]} {
    %c0 = arith.constant 0 : index
    %c0_0 = arith.constant 0 : index
    %c0_1 = arith.constant 0 : index
    %0 = vector.load %arg2[%c0, %c0_0, %c0_1] : memref<6x4x32xf32, #tpu.memory_space<vmem>>, vector<6x4x32xf32>
    %1 = vector.shape_cast %0 : vector<6x4x32xf32> to vector<24x32xf32>
    %c0_2 = arith.constant 0 : index
    %c0_3 = arith.constant 0 : index
    %2 = vector.load %arg3[%c0_2, %c0_3] : memref<648x256xf32, #tpu.memory_space<vmem>>, vector<32x256xf32>
    %cst = arith.constant dense<0.000000e+00> : vector<24x256xf32>
    %3 = tpu.matmul %1, %2, %cst {dimension_numbers = #tpu.dot_dimension_numbers<[1], [0], [0], [1], [0, 0, 1, 1], [], []>} : vector<24x32xf32>, vector<32x256xf32>, vector<24x256xf32> -> vector<24x256xf32>
    %c0_4 = arith.constant 0 : index
    %c0_5 = arith.constant 0 : index
    %4 = vector.load %arg4[%c0_4, %c0_5] : memref<16x256xf32, #tpu.memory_space<vmem>>, vector<1x256xf32>
    %5 = vector.broadcast %4 : vector<1x256xf32> to vector<24x256xf32>
    %6 = arith.addf %3, %5 : vector<24x256xf32>
    %c32 = arith.constant 32 : index
    %c0_6 = arith.constant 0 : index
    %7 = vector.load %arg3[%c32, %c0_6] : memref<648x256xf32, #tpu.memory_space<vmem>>, vector<32x64xf32>
    %cst_7 = arith.constant dense<0.000000e+00> : vector<24x64xf32>
    %8 = tpu.matmul %1, %7, %cst_7 {dimension_numbers = #tpu.dot_dimension_numbers<[1], [0], [0], [1], [0, 0, 1, 1], [], []>} : vector<24x32xf32>, vector<32x64xf32>, vector<24x64xf32> -> vector<24x64xf32>
    %c1 = arith.constant 1 : index
    %c0_8 = arith.constant 0 : index
    %9 = vector.load %arg4[%c1, %c0_8] : memref<16x256xf32, #tpu.memory_space<vmem>>, vector<1x64xf32>
    %10 = vector.broadcast %9 : vector<1x64xf32> to vector<24x64xf32>
    %11 = arith.addf %8, %10 : vector<24x64xf32>
    %c64 = arith.constant 64 : index
    %c0_9 = arith.constant 0 : index
    %12 = vector.load %arg3[%c64, %c0_9] : memref<648x256xf32, #tpu.memory_space<vmem>>, vector<32x8xf32>
    %cst_10 = arith.constant dense<0.000000e+00> : vector<24x8xf32>
    %13 = tpu.matmul %1, %12, %cst_10 {dimension_numbers = #tpu.dot_dimension_numbers<[1], [0], [0], [1], [0, 0, 1, 1], [], []>} : vector<24x32xf32>, vector<32x8xf32>, vector<24x8xf32> -> vector<24x8xf32>
    %cst_11 = arith.constant 1.000000e+00 : f32
    %14 = vector.broadcast %cst_11 : f32 to vector<24x8xf32>
    %15 = arith.cmpf one, %13, %14 : vector<24x8xf32>
    %16 = arith.extui %15 : vector<24x8xi1> to vector<24x8xi32>
    %17 = arith.sitofp %16 : vector<24x8xi32> to vector<24x8xf32>
    %cst_12 = arith.constant dense<0.000000e+00> : vector<24xf32>
    %18 = vector.multi_reduction <add>, %17, %cst_12 [1] : vector<24x8xf32> to vector<24xf32>
    %19 = vector.shape_cast %18 : vector<24xf32> to vector<24x1xf32>
    %cst_13 = arith.constant 8.000000e+00 : f32
    %20 = vector.broadcast %cst_13 : f32 to vector<24x1xf32>
    %21 = arith.cmpf oge, %19, %20 : vector<24x1xf32>
    %22 = arith.extui %21 : vector<24x1xi1> to vector<24x1xi32>
    %23 = arith.sitofp %22 : vector<24x1xi32> to vector<24x1xf32>
    %c2 = arith.constant 2 : index
    %c0_14 = arith.constant 0 : index
    %24 = vector.load %arg4[%c2, %c0_14] : memref<16x256xf32, #tpu.memory_space<vmem>>, vector<1x8xf32>
    %25 = vector.broadcast %23 : vector<24x1xf32> to vector<24x8xf32>
    %26 = vector.broadcast %24 : vector<1x8xf32> to vector<24x8xf32>
    %27 = arith.mulf %25, %26 : vector<24x8xf32>
    %28 = arith.subf %17, %27 : vector<24x8xf32>
    %c96 = arith.constant 96 : index
    %c0_15 = arith.constant 0 : index
    %29 = vector.load %arg3[%c96, %c0_15] : memref<648x256xf32, #tpu.memory_space<vmem>>, vector<8x64xf32>
    %cst_16 = arith.constant dense<0.000000e+00> : vector<24x64xf32>
    %30 = tpu.matmul %28, %29, %cst_16 {dimension_numbers = #tpu.dot_dimension_numbers<[1], [0], [0], [1], [0, 0, 1, 1], [], []>} : vector<24x8xf32>, vector<8x64xf32>, vector<24x64xf32> -> vector<24x64xf32>
    %31 = arith.addf %11, %30 : vector<24x64xf32>
    %c8_i32 = arith.constant 8 : i32
    %32 = tpu.dynamic_rotate %31 by %c8_i32 dim 1 : vector<24x64xf32>, i32 -> vector<24x64xf32>
    %33 = arith.maximumf %31, %32 : vector<24x64xf32>
    %c16_i32 = arith.constant 16 : i32
    %34 = tpu.dynamic_rotate %33 by %c16_i32 dim 1 : vector<24x64xf32>, i32 -> vector<24x64xf32>
    %35 = arith.maximumf %33, %34 : vector<24x64xf32>
    %c32_i32 = arith.constant 32 : i32
    %36 = tpu.dynamic_rotate %35 by %c32_i32 dim 1 : vector<24x64xf32>, i32 -> vector<24x64xf32>
    %37 = arith.maximumf %35, %36 : vector<24x64xf32>
    %38 = arith.subf %31, %37 : vector<24x64xf32>
    %39 = math.exp %38 : vector<24x64xf32>
    %c168 = arith.constant 168 : index
    %c0_17 = arith.constant 0 : index
    %40 = vector.load %arg3[%c168, %c0_17] : memref<648x256xf32, #tpu.memory_space<vmem>>, vector<64x32xf32>
    %cst_18 = arith.constant dense<0.000000e+00> : vector<24x32xf32>
    %41 = tpu.matmul %39, %40, %cst_18 {dimension_numbers = #tpu.dot_dimension_numbers<[1], [0], [0], [1], [0, 0, 1, 1], [], []>} : vector<24x64xf32>, vector<64x32xf32>, vector<24x32xf32> -> vector<24x32xf32>
    %c104 = arith.constant 104 : index
    %c0_19 = arith.constant 0 : index
    %42 = vector.load %arg3[%c104, %c0_19] : memref<648x256xf32, #tpu.memory_space<vmem>>, vector<64x256xf32>
    %cst_20 = arith.constant dense<0.000000e+00> : vector<24x256xf32>
    %43 = tpu.matmul %39, %42, %cst_20 {dimension_numbers = #tpu.dot_dimension_numbers<[1], [0], [0], [1], [0, 0, 1, 1], [], []>} : vector<24x64xf32>, vector<64x256xf32>, vector<24x256xf32> -> vector<24x256xf32>
    %44 = arith.mulf %43, %6 : vector<24x256xf32>
    %c232 = arith.constant 232 : index
    %c0_21 = arith.constant 0 : index
    %45 = vector.load %arg3[%c232, %c0_21] : memref<648x256xf32, #tpu.memory_space<vmem>>, vector<256x32xf32>
    %cst_22 = arith.constant dense<0.000000e+00> : vector<24x32xf32>
    %46 = tpu.matmul %44, %45, %cst_22 {dimension_numbers = #tpu.dot_dimension_numbers<[1], [0], [0], [1], [0, 0, 1, 1], [], []>} : vector<24x256xf32>, vector<256x32xf32>, vector<24x32xf32> -> vector<24x32xf32>
    %47 = tpu.reciprocal %41 {approx = true} : vector<24x32xf32> -> vector<24x32xf32>
    %48 = arith.mulf %41, %47 : vector<24x32xf32>
    %cst_23 = arith.constant 2.000000e+00 : f32
    %49 = vector.broadcast %cst_23 : f32 to vector<24x32xf32>
    %50 = arith.subf %49, %48 : vector<24x32xf32>
    %51 = arith.mulf %47, %50 : vector<24x32xf32>
    %52 = arith.mulf %46, %51 : vector<24x32xf32>
    %c488 = arith.constant 488 : index
    %c0_24 = arith.constant 0 : index
    %53 = vector.load %arg3[%c488, %c0_24] : memref<648x256xf32, #tpu.memory_space<vmem>>, vector<32x32xf32>
    %cst_25 = arith.constant dense<0.000000e+00> : vector<24x32xf32>
    %54 = tpu.matmul %52, %53, %cst_25 {dimension_numbers = #tpu.dot_dimension_numbers<[1], [0], [0], [1], [0, 0, 1, 1], [], []>} : vector<24x32xf32>, vector<32x32xf32>, vector<24x32xf32> -> vector<24x32xf32>
    %c3 = arith.constant 3 : index
    %c0_26 = arith.constant 0 : index
    %55 = vector.load %arg4[%c3, %c0_26] : memref<16x256xf32, #tpu.memory_space<vmem>>, vector<1x32xf32>
    %56 = vector.broadcast %55 : vector<1x32xf32> to vector<24x32xf32>
    %57 = arith.addf %54, %56 : vector<24x32xf32>
    %c4 = arith.constant 4 : index
    %c0_27 = arith.constant 0 : index
    %58 = vector.load %arg4[%c4, %c0_27] : memref<16x256xf32, #tpu.memory_space<vmem>>, vector<1x32xf32>
    %c5 = arith.constant 5 : index
    %c0_28 = arith.constant 0 : index
    %59 = vector.load %arg4[%c5, %c0_28] : memref<16x256xf32, #tpu.memory_space<vmem>>, vector<1x32xf32>
    %cst_29 = arith.constant dense<0.000000e+00> : vector<24xf32>
    %60 = vector.multi_reduction <add>, %57, %cst_29 [1] : vector<24x32xf32> to vector<24xf32>
    %61 = vector.shape_cast %60 : vector<24xf32> to vector<24x1xf32>
    %cst_30 = arith.constant 3.200000e+01 : f32
    %62 = vector.broadcast %cst_30 : f32 to vector<24x1xf32>
    %63 = arith.divf %61, %62 : vector<24x1xf32>
    %64 = vector.broadcast %63 : vector<24x1xf32> to vector<24x32xf32>
    %65 = arith.subf %57, %64 : vector<24x32xf32>
    %66 = arith.mulf %65, %65 : vector<24x32xf32>
    %cst_31 = arith.constant dense<0.000000e+00> : vector<24xf32>
    %67 = vector.multi_reduction <add>, %66, %cst_31 [1] : vector<24x32xf32> to vector<24xf32>
    %68 = vector.shape_cast %67 : vector<24xf32> to vector<24x1xf32>
    %cst_32 = arith.constant 3.200000e+01 : f32
    %69 = vector.broadcast %cst_32 : f32 to vector<24x1xf32>
    %70 = arith.divf %68, %69 : vector<24x1xf32>
    %71 = vector.broadcast %63 : vector<24x1xf32> to vector<24x32xf32>
    %72 = arith.subf %57, %71 : vector<24x32xf32>
    %cst_33 = arith.constant 9.99999974E-6 : f32
    %73 = vector.broadcast %cst_33 : f32 to vector<24x1xf32>
    %74 = arith.addf %70, %73 : vector<24x1xf32>
    %75 = math.rsqrt %74 : vector<24x1xf32>
    %76 = vector.broadcast %75 : vector<24x1xf32> to vector<24x32xf32>
    %77 = arith.mulf %72, %76 : vector<24x32xf32>
    %78 = vector.broadcast %58 : vector<1x32xf32> to vector<24x32xf32>
    %79 = arith.mulf %77, %78 : vector<24x32xf32>
    %80 = vector.broadcast %59 : vector<1x32xf32> to vector<24x32xf32>
    %81 = arith.addf %79, %80 : vector<24x32xf32>
    %c520 = arith.constant 520 : index
    %c0_34 = arith.constant 0 : index
    %82 = vector.load %arg3[%c520, %c0_34] : memref<648x256xf32, #tpu.memory_space<vmem>>, vector<32x96xf32>
    %cst_35 = arith.constant dense<0.000000e+00> : vector<24x96xf32>
    %83 = tpu.matmul %81, %82, %cst_35 {dimension_numbers = #tpu.dot_dimension_numbers<[1], [0], [0], [1], [0, 0, 1, 1], [], []>} : vector<24x32xf32>, vector<32x96xf32>, vector<24x96xf32> -> vector<24x96xf32>
    %c6 = arith.constant 6 : index
    %c0_36 = arith.constant 0 : index
    %84 = vector.load %arg4[%c6, %c0_36] : memref<16x256xf32, #tpu.memory_space<vmem>>, vector<1x96xf32>
    %85 = vector.broadcast %84 : vector<1x96xf32> to vector<24x96xf32>
    %86 = arith.addf %83, %85 : vector<24x96xf32>
    %cst_37 = arith.constant 0.000000e+00 : f32
    %87 = vector.broadcast %cst_37 : f32 to vector<24x96xf32>
    %88 = arith.maximumf %86, %87 : vector<24x96xf32>
    %c552 = arith.constant 552 : index
    %c0_38 = arith.constant 0 : index
    %89 = vector.load %arg3[%c552, %c0_38] : memref<648x256xf32, #tpu.memory_space<vmem>>, vector<96x32xf32>
    %cst_39 = arith.constant dense<0.000000e+00> : vector<24x32xf32>
    %90 = tpu.matmul %88, %89, %cst_39 {dimension_numbers = #tpu.dot_dimension_numbers<[1], [0], [0], [1], [0, 0, 1, 1], [], []>} : vector<24x96xf32>, vector<96x32xf32>, vector<24x32xf32> -> vector<24x32xf32>
    %c7 = arith.constant 7 : index
    %c0_40 = arith.constant 0 : index
    %91 = vector.load %arg4[%c7, %c0_40] : memref<16x256xf32, #tpu.memory_space<vmem>>, vector<1x32xf32>
    %92 = vector.broadcast %91 : vector<1x32xf32> to vector<24x32xf32>
    %93 = arith.addf %90, %92 : vector<24x32xf32>
    %94 = arith.addf %81, %93 : vector<24x32xf32>
    %c8 = arith.constant 8 : index
    %c0_41 = arith.constant 0 : index
    %95 = vector.load %arg4[%c8, %c0_41] : memref<16x256xf32, #tpu.memory_space<vmem>>, vector<1x32xf32>
    %c9 = arith.constant 9 : index
    %c0_42 = arith.constant 0 : index
    %96 = vector.load %arg4[%c9, %c0_42] : memref<16x256xf32, #tpu.memory_space<vmem>>, vector<1x32xf32>
    %cst_43 = arith.constant dense<0.000000e+00> : vector<24xf32>
    %97 = vector.multi_reduction <add>, %94, %cst_43 [1] : vector<24x32xf32> to vector<24xf32>
    %98 = vector.shape_cast %97 : vector<24xf32> to vector<24x1xf32>
    %cst_44 = arith.constant 3.200000e+01 : f32
    %99 = vector.broadcast %cst_44 : f32 to vector<24x1xf32>
    %100 = arith.divf %98, %99 : vector<24x1xf32>
    %101 = vector.broadcast %100 : vector<24x1xf32> to vector<24x32xf32>
    %102 = arith.subf %94, %101 : vector<24x32xf32>
    %103 = arith.mulf %102, %102 : vector<24x32xf32>
    %cst_45 = arith.constant dense<0.000000e+00> : vector<24xf32>
    %104 = vector.multi_reduction <add>, %103, %cst_45 [1] : vector<24x32xf32> to vector<24xf32>
    %105 = vector.shape_cast %104 : vector<24xf32> to vector<24x1xf32>
    %cst_46 = arith.constant 3.200000e+01 : f32
    %106 = vector.broadcast %cst_46 : f32 to vector<24x1xf32>
    %107 = arith.divf %105, %106 : vector<24x1xf32>
    %108 = vector.broadcast %100 : vector<24x1xf32> to vector<24x32xf32>
    %109 = arith.subf %94, %108 : vector<24x32xf32>
    %cst_47 = arith.constant 9.99999974E-6 : f32
    %110 = vector.broadcast %cst_47 : f32 to vector<24x1xf32>
    %111 = arith.addf %107, %110 : vector<24x1xf32>
    %112 = math.rsqrt %111 : vector<24x1xf32>
    %113 = vector.broadcast %112 : vector<24x1xf32> to vector<24x32xf32>
    %114 = arith.mulf %109, %113 : vector<24x32xf32>
    %115 = vector.broadcast %95 : vector<1x32xf32> to vector<24x32xf32>
    %116 = arith.mulf %114, %115 : vector<24x32xf32>
    %117 = vector.broadcast %96 : vector<1x32xf32> to vector<24x32xf32>
    %118 = arith.addf %116, %117 : vector<24x32xf32>
    %119 = vector.shape_cast %118 : vector<24x32xf32> to vector<6x4x32xf32>
    %120 = vector.extract_strided_slice %119 {offsets = [0, 0, 0], sizes = [1, 4, 32], strides = [1, 1, 1]} : vector<6x4x32xf32> to vector<1x4x32xf32>
    %121 = vector.shape_cast %120 : vector<1x4x32xf32> to vector<4x32xf32>
    %c0_48 = arith.constant 0 : index
    %c0_49 = arith.constant 0 : index
    %122 = vector.load %arg5[%c0_48, %c0_49] : memref<4x192xf32, #tpu.memory_space<vmem>>, vector<4x32xf32>
    tpu.vector_store %arg5[%c0_48, %c0_49], %121 {strides = array<i32>} : memref<4x192xf32, #tpu.memory_space<vmem>>, vector<4x32xf32>,
    %123 = vector.extract_strided_slice %119 {offsets = [1, 0, 0], sizes = [1, 4, 32], strides = [1, 1, 1]} : vector<6x4x32xf32> to vector<1x4x32xf32>
    %124 = vector.shape_cast %123 : vector<1x4x32xf32> to vector<4x32xf32>
    %c0_50 = arith.constant 0 : index
    %c32_51 = arith.constant 32 : index
    %125 = vector.load %arg5[%c0_50, %c32_51] : memref<4x192xf32, #tpu.memory_space<vmem>>, vector<4x32xf32>
    tpu.vector_store %arg5[%c0_50, %c32_51], %124 {strides = array<i32>} : memref<4x192xf32, #tpu.memory_space<vmem>>, vector<4x32xf32>,
    %126 = vector.extract_strided_slice %119 {offsets = [2, 0, 0], sizes = [1, 4, 32], strides = [1, 1, 1]} : vector<6x4x32xf32> to vector<1x4x32xf32>
    %127 = vector.shape_cast %126 : vector<1x4x32xf32> to vector<4x32xf32>
    %c0_52 = arith.constant 0 : index
    %c64_53 = arith.constant 64 : index
    %128 = vector.load %arg5[%c0_52, %c64_53] : memref<4x192xf32, #tpu.memory_space<vmem>>, vector<4x32xf32>
    tpu.vector_store %arg5[%c0_52, %c64_53], %127 {strides = array<i32>} : memref<4x192xf32, #tpu.memory_space<vmem>>, vector<4x32xf32>,
    %129 = vector.extract_strided_slice %119 {offsets = [3, 0, 0], sizes = [1, 4, 32], strides = [1, 1, 1]} : vector<6x4x32xf32> to vector<1x4x32xf32>
    %130 = vector.shape_cast %129 : vector<1x4x32xf32> to vector<4x32xf32>
    %c0_54 = arith.constant 0 : index
    %c96_55 = arith.constant 96 : index
    %131 = vector.load %arg5[%c0_54, %c96_55] : memref<4x192xf32, #tpu.memory_space<vmem>>, vector<4x32xf32>
    tpu.vector_store %arg5[%c0_54, %c96_55], %130 {strides = array<i32>} : memref<4x192xf32, #tpu.memory_space<vmem>>, vector<4x32xf32>,
    %132 = vector.extract_strided_slice %119 {offsets = [4, 0, 0], sizes = [1, 4, 32], strides = [1, 1, 1]} : vector<6x4x32xf32> to vector<1x4x32xf32>
    %133 = vector.shape_cast %132 : vector<1x4x32xf32> to vector<4x32xf32>
    %c0_56 = arith.constant 0 : index
    %c128 = arith.constant 128 : index
    %134 = vector.load %arg5[%c0_56, %c128] : memref<4x192xf32, #tpu.memory_space<vmem>>, vector<4x32xf32>
    tpu.vector_store %arg5[%c0_56, %c128], %133 {strides = array<i32>} : memref<4x192xf32, #tpu.memory_space<vmem>>, vector<4x32xf32>,
    %135 = vector.extract_strided_slice %119 {offsets = [5, 0, 0], sizes = [1, 4, 32], strides = [1, 1, 1]} : vector<6x4x32xf32> to vector<1x4x32xf32>
    %136 = vector.shape_cast %135 : vector<1x4x32xf32> to vector<4x32xf32>
    %c0_57 = arith.constant 0 : index
    %c160 = arith.constant 160 : index
    %137 = vector.load %arg5[%c0_57, %c160] : memref<4x192xf32, #tpu.memory_space<vmem>>, vector<4x32xf32>
    tpu.vector_store %arg5[%c0_57, %c160], %136 {strides = array<i32>} : memref<4x192xf32, #tpu.memory_space<vmem>>, vector<4x32xf32>,
    return
  }
  func.func @transform_0(%arg0: i32, %arg1: i32) -> (i32, i32, i32) {
    %c0_i32 = arith.constant 0 : i32
    %c0_i32_0 = arith.constant 0 : i32
    return %arg0, %arg1, %c0_i32 : i32, i32, i32
  }
  func.func @transform_1(%arg0: i32, %arg1: i32) -> (i32, i32) {
    %c0_i32 = arith.constant 0 : i32
    %c0_i32_0 = arith.constant 0 : i32
    %c0_i32_1 = arith.constant 0 : i32
    return %c0_i32, %c0_i32_0 : i32, i32
  }
  func.func @transform_2(%arg0: i32, %arg1: i32) -> (i32, i32) {
    %c0_i32 = arith.constant 0 : i32
    %c0_i32_0 = arith.constant 0 : i32
    %c0_i32_1 = arith.constant 0 : i32
    return %c0_i32, %c0_i32_0 : i32, i32
  }
  func.func @transform_3(%arg0: i32, %arg1: i32) -> (i32, i32) {
    %c0_i32 = arith.constant 0 : i32
    return %arg1, %arg0 : i32, i32
  }
}

</mosaic_0001>

<bundles_post_ra>
// kernel: tpu_custom_call.1
= control target key start
LH: loop header
LB: loop body
LE: loop exit
PB: predicated region body
PF: predicated region fallthrough
CT: control target
= control target key end

     0   :  { %8 = vsyncpa [#allocation3], 0  ;;  %s2188_s0 = inlined_call_operand.hbm [shape: f32[6,4,32], index: 0, kind: input, shape index: {}]   ;;  %s2189_s1 = inlined_call_operand.hbm [shape: f32[648,256], index: 1, kind: input, shape index: {}]   ;;  %s2190_s2 = inlined_call_operand.hbm [shape: f32[16,256], index: 2, kind: input, shape index: {}]   ;;  %s2191_s3 = inlined_call_operand.hbm [shape: f32[4,192], index: 3, kind: output, shape index: {}]  }
   0x1   :  { %9 = vsyncpa [#allocation6], 0 }
   0x2   :  { %10 = vsyncpa [#allocation4], 0  ;;  %s1879_s12 = smov [#allocation5]   ;;  %s1785_s16 = scalar_lea.hbm %s2189_s1, 20736 }
   0x3   :  { %s28_s13 = sshll.u32 %s1879_s12, 4  ;;  %p1786_p0 = scmp.ne.s32.totalorder %s2189_s1, %s1785_s16  ;;  %s29_s13 = int_to_ptr.vmem [resolvable:$true] %s28_s13 }
   0x4   :  { %p1789_p1 = scmp.lt.u32.totalorder %s1785_s16, %s2189_s1 }
   0x6   :  { %p1791_p2 = pnand %p1789_p1, %p1786_p0 }
   0x8   :  { %1794 = shalt.err (!%p1791_p2)
}
   0x9   :  { %s1795_s21 = scalar_lea.vmem %s29_s13, 20736  ;;  %p1800_p4 = scmp.lt.s32.totalorder %s29_s13, %s29_s13 }
   0xa   :  { %p1796_p3 = scmp.ne.s32.totalorder %s29_s13, %s1795_s21  ;;  %p1801_p5 = scmp.lt.s32.totalorder %s1795_s21, %s1795_s21 }
   0xc   :  { %p1802_p6 = por %p1801_p5, %p1800_p4 }
   0xe   :  { %p1803_p7 = pnand %p1802_p6, %p1796_p3 }
  0x10   :  { %1806 = shalt.err (!%p1803_p7)
}
  0x11   :  { %s1880_s22 = smov 256   ;;  %s1881_s23 = smov 16  }
  0x12   :  { %34 = dma.hbm_to_vmem [thread:$0]  %s2189_s1, 20736, %s29_s13, [#allocation6], %s1880_s22, %s1880_s22, %s1881_s23  }
  0x13   :  { %s1882_s26 = smov [#allocation2]   ;;  %s1807_s30 = scalar_lea.hbm %s2188_s0, 384 }
  0x14   :  { %s16_s27 = sshll.u32 %s1882_s26, 4  ;;  %p1808_p8 = scmp.ne.s32.totalorder %s2188_s0, %s1807_s30  ;;  %s17_s27 = int_to_ptr.vmem [resolvable:$true] %s16_s27 }
  0x15   :  { %p1811_p9 = scmp.lt.u32.totalorder %s1807_s30, %s2188_s0 }
  0x17   :  { %p1813_p10 = pnand %p1811_p9, %p1808_p8 }
  0x19   :  { %1816 = shalt.err (!%p1813_p10)
}
  0x1a   :  { %s1817_s8 = scalar_lea.vmem %s17_s27, 384  ;;  %p1822_p12 = scmp.lt.s32.totalorder %s17_s27, %s17_s27 }
  0x1b   :  { %p1818_p11 = scmp.ne.s32.totalorder %s17_s27, %s1817_s8  ;;  %p1823_p13 = scmp.lt.s32.totalorder %s1817_s8, %s1817_s8 }
  0x1d   :  { %p1824_p0 = por %p1823_p13, %p1822_p12 }
  0x1f   :  { %p1825_p1 = pnand %p1824_p0, %p1818_p11 }
  0x21   :  { %1828 = shalt.err (!%p1825_p1)
}
  0x22   :  { %s1883_s1 = smov 64   ;;  %s1884_s9 = smov 4  }
  0x23   :  { %22 = dma.hbm_to_vmem [thread:$0]  %s2188_s0, 384, %s17_s27, [#allocation3], %s1883_s1, %s1883_s1, %s1884_s9  }
  0x24   :  { %s1885_s12 = smov [#allocation7]   ;;  %s1829_s16 = scalar_lea.hbm %s2190_s2, 512 }
  0x25   :  { %s40_s13 = sshll.u32 %s1885_s12, 4  ;;  %p1830_p2 = scmp.ne.s32.totalorder %s2190_s2, %s1829_s16  ;;  %s41_s13 = int_to_ptr.vmem [resolvable:$true] %s40_s13 }
  0x26   :  { %p1833_p3 = scmp.lt.u32.totalorder %s1829_s16, %s2190_s2 }
  0x28   :  { %p1835_p4 = pnand %p1833_p3, %p1830_p2 }
  0x2a   :  { %1838 = shalt.err (!%p1835_p4)
}
  0x2b   :  { %s1839_s21 = scalar_lea.vmem %s41_s13, 512  ;;  %p1844_p6 = scmp.lt.s32.totalorder %s41_s13, %s41_s13 }
  0x2c   :  { %p1840_p5 = scmp.ne.s32.totalorder %s41_s13, %s1839_s21  ;;  %p1845_p7 = scmp.lt.s32.totalorder %s1839_s21, %s1839_s21 }
  0x2e   :  { %p1846_p8 = por %p1845_p7, %p1844_p6 }
  0x30   :  { %p1847_p9 = pnand %p1846_p8, %p1840_p5 }
  0x32   :  { %1850 = shalt.err (!%p1847_p9)
}
  0x33   :  { %46 = dma.hbm_to_vmem [thread:$0]  %s2190_s2, 512, %s41_s13, [#allocation6], %s1880_s22, %s1880_s22, %s1881_s23  }
  0x34   :  { %1873 = dma.done.wait [#allocation3], 384  }
  0x35   :  { %1874 = vsyncadd [#allocation3], 4294966912 }
  0x36   :  { %1875 = dma.done.wait [#allocation6], 21248  }
  0x37   :  { %1876 = vsyncadd [#allocation6], 4294946048  ;;  %v1886_v0 = vmov 0.0   ;;  %v1887_v1 = vmov 0.0|0.0   ;;  %vm1888_vm0 = vmmov 0   ;;  %v63_v2 = vld [vmem:[#allocation5 + $0x8] sm:$0xff] }
  0x38   :  { %162 = vmatprep.mubr.f32.mxu0 %v1886_v0  ;;  %1732 = vmatprep.subr.bf16.mxu1 %v1887_v1  ;;  %v65_v3 = vld [vmem:[#allocation5 + $0x18] sm:$0xff]  ;;  %v62_v4 = vld [vmem:[#allocation5] sm:$0xff]  ;;  %v64_v6 = vld [vmem:[#allocation5 + $0x10] sm:$0xff]  ;;  %vm91_vm1 = vcmask 261120   ;;  %vm359_vm2 = vcmask 64512   ;;  %vm478_vm9 = vcmask 1048064  }
  0x39   :  { %1499 = vmatprep.mubr.msk.f32.mxu1 %vm1888_vm0, %v1886_v0  ;;  %v1622_v5 = vpack.c.bf16 %v65_v3, %v63_v2  ;;  %v67_v7 = vld [vmem:[#allocation5 + $0x28] sm:$0xff]  ;;  %v69_v8 = vld [vmem:[#allocation5 + $0x38] sm:$0xff]  ;;  %v1624_v9 = vpack.c.bf16 %v64_v6, %v62_v4  ;;  %v66_v11 = vld [vmem:[#allocation5 + $0x20] sm:$0xff]  ;;  %s1889_s2 = smov 72   ;;  %s1890_s22 = smov 80   ;;  %vm595_vm10 = vcmask 523264  }
  0x3a   :  { %v1626_v10 = vpack.c.bf16 %v69_v8, %v67_v7  ;;  %v68_v12 = vld [vmem:[#allocation5 + $0x30] sm:$0xff]  ;;  %v181_v13 = vld [vmem:[#allocation5 + $0x40] sm:$0xff]  ;;  %v1758_v19 = vld [vmem:[#allocation2] sm:$0xff]   ;;  %s1891_s23 = smov 96   ;;  %vm1169_vm11 = vcmask 785408   ;;  %vm1315_vm12 = vcmask 257024  }
  0x3b   :  { %1623 = vmatprep.subr.bf16.mxu0 %v1622_v5  ;;  %v1628_v14 = vpack.c.bf16 %v68_v12, %v66_v11  ;;  %v182_v15 = vld [vmem:[#allocation5 + $0x50] sm:$0xff]  ;;  %v183_v17 = vld [vmem:[#allocation5 + $0x60] sm:$0xff]  ;;  %v1760_v22 = vld [vmem:[#allocation2 + $0x10] sm:$0xff]   ;;  %s1892_s25 = smov 32   ;;  %vm1320_vm13 = vcmask 519424   ;;  %vm1325_vm14 = vcmask 781824  }
  0x3c   :  { %1625 = vmatpush1.bf16.msra.mxu0 %v1624_v9  ;;  %v1631_v16 = vpack.c.bf16 %v182_v15, %v181_v13  ;;  %v184_v18 = vld [vmem:[#allocation5 + $0x70] sm:$0xff]  ;;  %v266_v23 = vld [vmem:[#allocation5 + $0x80] sm:$0xff]  ;;  %vm1330_vm15 = vcmask 1044224   ;;  %s1893_s26 = smov [#allocation8]  }
  0x3d   :  { %1627 = vmatprep.subr.bf16.mxu0 %v1626_v10  ;;  %v1634_v20 = vpack.c.bf16 %v184_v18, %v183_v17  ;;  %v1759_v21 = vld [vmem:[#allocation2 + $0x8] sm:$0xff]   ;;  %v268_v26 = vld [vmem:[#allocation5 + $0xa0] sm:$0xff]  ;;  %s1343_s27 = sshll.u32 %s1893_s26, 4  ;;  %s1344_s27 = int_to_ptr.vmem [resolvable:$true] %s1343_s27 }
  0x3e   :  { %1734 = vmatpush3.bf16.msra.mxu1 %v1631_v16  ;;  %v267_v24 = vld [vmem:[#allocation5 + $0x90] sm:$0xff]  ;;  %v385_v51 = vld [vmem:[#allocation5 + $0xc0] sm:$0xff]  ;;  %s1851_s28 = scalar_lea.vmem %s1344_s27, 128  ;;  %p1856_p11 = scmp.lt.s32.totalorder %s1344_s27, %s1344_s27 }
  0x3f   :  { %1733 = vmatprep.subr.bf16.mxu1 %v1887_v1  ;;  %v1637_v25 = vpack.c.bf16 %v267_v24, %v266_v23  ;;  %v269_v27 = vld [vmem:[#allocation5 + $0xb0] sm:$0xff]  ;;  %p1852_p10 = scmp.ne.s32.totalorder %s1344_s27, %s1851_s28  ;;  %p1857_p12 = scmp.lt.s32.totalorder %s1851_s28, %s1851_s28 }
  0x40   :  { %1629 = vmatpush1.bf16.msra.mxu0 %v1628_v14  ;;  %v1640_v28 = vpack.c.bf16 %v269_v27, %v268_v26  ;;  %v378_v52 = vld [vmem:[#allocation7 + $0x2] ss:$0 sm:$0xff]  ;;  %v185_v3 = vld [vmem:[#allocation7 + $0x1] ss:$0 sm:$0xff] }
  0x41   :  { %1630 = vmatprep.subr.bf16.mxu0 %v1887_v1  ;;  %p1858_p13 = por %p1857_p12, %p1856_p11 }
  0x42   :  { %1735 = vmatpush3.bf16.msra.mxu1 %v1634_v20 }
  0x43   :  { %1353 = vmatmul.mubr.msk.f32.vlgmr.msra.gmra.mrb[0].mxu0 %vm91_vm1, %v1758_v19  ;;  %1519 = vmatprep.subr.mxu1 %v1886_v0  ;;  %p1859_p0 = pnand %p1858_p13, %p1852_p10 }
  0x44   :  { %1632 = vmatpush3.bf16.msra.mxu0 %v1631_v16  ;;  %168 = vmatprep.mubr.f32.mxu0 %v1886_v0 }
  0x45   :  { %1633 = vmatprep.subr.bf16.mxu0 %v1887_v1  ;;  %1500 = vmatmul.mubr.msk.f32.vlgmr.msra.gmra.mrb[0].mxu1 %vm91_vm1, %v1760_v22 }
  0x46   :  { %1521 = vmatprep.mubr.msk.f32.mxu1 %vm1888_vm0, %v1886_v0  ;;  %1520 = vmatpush3.msra.mxu1 %v385_v51 }
  0x47   :  { %1354 = vmatmul.mubr.msk.f32.gmra.mrb[2].mxu0 %vm91_vm1, %v1759_v21 }
  0x48   :  { %174 = vmatprep.mubr.f32.mxu0 %v1886_v0  ;;  %1635 = vmatpush3.bf16.msra.mxu0 %v1634_v20 }
  0x49   :  { %1636 = vmatprep.subr.bf16.mxu0 %v1887_v1 }
  0x4b   :  { %1355 = vmatmul.mubr.msk.f32.gmra.mrb[4].mxu0 %vm91_vm1, %v1760_v22 }
  0x4c   :  { %1493 = vmatprep.mubr.msk.f32.mxu0 %vm1888_vm0, %v1886_v0 }
  0x4f   :  { %1494 = vmatmul.mubr.msk.f32.vlgmr.msra.gmra.mrb[6].mxu0 %vm91_vm1, %v1758_v19 }
  0x50   :  { %1638 = vmatpush3.bf16.msra.mxu0 %v1637_v25  ;;  %1496 = vmatprep.mubr.msk.f32.mxu0 %vm1888_vm0, %v1886_v0 }
  0x51   :  { %1639 = vmatprep.subr.bf16.mxu0 %v1887_v1 }
  0x53   :  { %1497 = vmatmul.mubr.msk.f32.gmra.mrb[8].mxu0 %vm91_vm1, %v1759_v21 }
  0x54   :  { %1641 = vmatpush3.bf16.msra.mxu0 %v1640_v28  ;;  %1510 = vmatprep.mubr.msk.f32.mxu0 %vm1888_vm0, %v1886_v0 }
  0x55   :  { %1642 = vmatprep.subr.bf16.mxu0 %v1887_v1 }
  0x57   :  { %1511 = vmatmul.mubr.msk.f32.vlgmr.msra.gmra.mrb[10].mxu0 %vm91_vm1, %v1758_v19 }
  0x58   :  { %1513 = vmatprep.mubr.msk.f32.mxu0 %vm1888_vm0, %v1886_v0 }
  0x5b   :  { %1514 = vmatmul.mubr.msk.f32.gmra.mrb[12].mxu0 %vm91_vm1, %v1759_v21 }
  0x5c   :  { %1516 = vmatprep.mubr.msk.f32.mxu0 %vm1888_vm0, %v1886_v0 }
  0x5f   :  { %1517 = vmatmul.mubr.msk.f32.gmra.mrb[14].mxu0 %vm91_vm1, %v1760_v22 }
  0x60   :  { %1546 = vmatprep.mubr.msk.f32.mxu0 %vm1888_vm0, %v1886_v0 }
 0x116   :  { %v1994_v29 = vpop.f32.mrb[0].mxu0 }
 0x117   :  { %v1996_v30 = vpop.f32.mrb[1].mxu0 }
 0x11a   :  { %v1998_v31 = vpop.f32.mrb[2].mxu0 }
 0x11b   :  { %v2000_v32 = vpop.f32.mrb[3].mxu0 }
 0x11e   :  { %v2002_v33 = vpop.f32.mrb[4].mxu0 }
 0x11f   :  { %v2004_v34 = vpop.f32.mrb[5].mxu0 }
 0x122   :  { %v252_v35 = vpop.f32.mrb[6].mxu0 }
 0x123   :  { %v1495_v36 = vpop.f32.mrb[7].mxu0  ;;  %v253_v4 = vadd.f32 %v252_v35, %v185_v3 }
 0x126   :  { %v257_v37 = vpop.f32.mrb[8].mxu0 }
 0x127   :  { %v1498_v38 = vpop.f32.mrb[9].mxu0  ;;  %v258_v8 = vadd.f32 %v257_v37, %v185_v3 }
 0x12a   :  { %v336_v39 = vpop.f32.mrb[10].mxu0 }
 0x12b   :  { %vm350_vm3 = vcmp.ne.f32.partialorder %v336_v39, 1.0  ;;  %v1512_v40 = vpop.f32.mrb[11].mxu0 }
 0x12c   :  { %v1362_v41 = vsel %vm350_vm3, 1.0, %v1886_v0 }
 0x12d   :  { %v360_v42 = vsel %vm359_vm2, %v1362_v41, 0.0 }
 0x12e   :  { %361 = vadd.xlane.f32.xlu0 %v360_v42  ;;  %v341_v43 = vpop.f32.mrb[12].mxu0 }
 0x12f   :  { %vm351_vm4 = vcmp.ne.f32.partialorder %v341_v43, 1.0  ;;  %v1515_v44 = vpop.f32.mrb[13].mxu0 }
 0x130   :  { %v1363_v45 = vsel %vm351_vm4, 1.0, %v1886_v0 }
 0x131   :  { %v363_v46 = vsel %vm359_vm2, %v1363_v45, 0.0 }
 0x132   :  { %364 = vadd.xlane.f32.xlu0 %v363_v46  ;;  %v346_v47 = vpop.f32.mrb[14].mxu0 }
 0x133   :  { %vm352_vm5 = vcmp.ne.f32.partialorder %v346_v47, 1.0  ;;  %v1518_v48 = vpop.f32.mrb[15].mxu0 }
 0x134   :  { %v1364_v49 = vsel %vm352_vm5, 1.0, %v1886_v0 }
 0x135   :  { %v366_v50 = vsel %vm359_vm2, %v1364_v49, 0.0 }
 0x136   :  { %367 = vadd.xlane.f32.xlu1 %v366_v50 }
 0x1bb   :  { %v362_v53 = vpop.xlane.xlu0 %361 }
 0x1bc   :  { %vm369_vm6 = vcmp.ge.f32.partialorder %v362_v53, 8.0 }
 0x1bd   :  { %v1365_v54 = vsel %vm369_vm6, 1.0, %v1886_v0 }
 0x1be   :  { %v379_v55 = vmul.f32 %v1365_v54, %v378_v52 }
 0x1bf   :  { %v365_v56 = vpop.xlane.xlu0 %364 }
 0x1c0   :  { %v382_v57 = vsub.f32 %v1362_v41, %v379_v55  ;;  %vm370_vm7 = vcmp.ge.f32.partialorder %v365_v56, 8.0 }
 0x1c1   :  { %v1366_v58 = vsel %vm370_vm7, 1.0, %v1886_v0 }
 0x1c2   :  { %v380_v59 = vmul.f32 %v1366_v58, %v378_v52  ;;  %1522 = vmatmul.mubr.msk.f32.vlgmr.msra.gmra.mrb[2].mxu1 %vm359_vm2, %v382_v57 }
 0x1c3   :  { %v368_v60 = vpop.xlane.xlu1 %367  ;;  %1524 = vmatprep.mubr.msk.f32.mxu1 %vm1888_vm0, %v1886_v0 }
 0x1c4   :  { %v383_v61 = vsub.f32 %v1363_v45, %v380_v59  ;;  %vm371_vm8 = vcmp.ge.f32.partialorder %v368_v60, 8.0 }
 0x1c5   :  { %v1367_v62 = vsel %vm371_vm8, 1.0, %v1886_v0 }
 0x1c6   :  { %v381_v63 = vmul.f32 %v1367_v62, %v378_v52  ;;  %1525 = vmatmul.mubr.msk.f32.gmra.mrb[4].mxu1 %vm359_vm2, %v383_v61 }
 0x1c7   :  { %1527 = vmatprep.mubr.msk.f32.mxu1 %vm1888_vm0, %v1886_v0 }
 0x1c8   :  { %v384_v2 = vsub.f32 %v1364_v49, %v381_v63  ;;  %v686_v63 = vld [vmem:[#allocation5 + $0xd8] sm:$0xff] }
 0x1ca   :  { %1528 = vmatmul.mubr.msk.f32.gmra.mrb[0].mxu1 %vm359_vm2, %v384_v2  ;;  %v688_v2 = vld [vmem:[#allocation5 + $0xe8] sm:$0xff] }
 0x1cb   :  { %765 = vmatprep.mubr.f32.mxu1 %v1886_v0 }
 0x295   :  { %v461_v5 = vpop.f32.mrb[2].mxu1 }
 0x296   :  { %v2023_v6 = vadd.f32 %v461_v5, %v253_v4  ;;  %v1523_v7 = vpop.f32.mrb[3].mxu1  ;;  %v587_v4 = vld [vmem:[#allocation5 + $0x150] sm:$0xff]  ;;  %v588_v5 = vld [vmem:[#allocation5 + $0x160] sm:$0xff] }
 0x297   :  { %v685_v7 = vld [vmem:[#allocation5 + $0xd0] sm:$0xff] }
 0x298   :  { %479 = vrot.lane.b32.xlu1 %v2023_v6, %s1883_s1 }
 0x299   :  { %v466_v9 = vpop.f32.mrb[4].mxu1 }
 0x29a   :  { %v2027_v10 = vadd.f32 %v466_v9, %v258_v8  ;;  %v1526_v11 = vpop.f32.mrb[5].mxu1  ;;  %v1643_v8 = vpack.c.bf16 %v588_v5, %v587_v4  ;;  %v687_v9 = vld [vmem:[#allocation5 + $0xe0] sm:$0xff] }
 0x29b   :  { %v1656_v11 = vpack.c.bf16 %v687_v9, %v685_v7  ;;  %v790_v9 = vld [vmem:[#allocation5 + $0x1d0] sm:$0xff] }
 0x29c   :  { %482 = vrot.lane.b32.xlu0 %v2027_v10, %s1883_s1  ;;  %1644 = vmatpush3.bf16.msra.mxu0 %v1643_v8 }
 0x29d   :  { %v471_v12 = vpop.f32.mrb[0].mxu1  ;;  %1645 = vmatprep.subr.bf16.mxu0 %v1887_v1 }
 0x29e   :  { %v2031_v13 = vadd.f32 %v471_v12, %v185_v3  ;;  %v1529_v14 = vpop.f32.mrb[1].mxu1  ;;  %v1654_v3 = vpack.c.bf16 %v688_v2, %v686_v63  ;;  %v690_v12 = vld [vmem:[#allocation5 + $0xf8] sm:$0xff] }
 0x29f   :  { %v692_v14 = vld [vmem:[#allocation5 + $0x108] sm:$0xff] }
 0x2a0   :  { %485 = vrot.lane.b32.xlu1 %v2031_v13, %s1883_s1  ;;  %1655 = vmatprep.subr.bf16.mxu1 %v1654_v3 }
 0x2a1   :  { %1657 = vmatpush1.bf16.msra.mxu1 %v1656_v11  ;;  %v791_v11 = vld [vmem:[#allocation5 + $0x1e0] sm:$0xff] }
 0x30a   :  { %v480_v15 = vpop.permute.xlu1 %479 }
 0x30b   :  { %v481_v16 = vsel %vm478_vm9, %v480_v15, %v2023_v6  ;;  %v1658_v15 = vpack.c.bf16 %v692_v14, %v690_v12  ;;  %v809_v12 = vld [vmem:[#allocation5 + $0x300] sm:$0xff] }
 0x30c   :  { %488 = vrot.lane.b32.xlu1 %v481_v16, %s1883_s1  ;;  %v589_v16 = vld [vmem:[#allocation5 + $0x170] sm:$0xff] }
 0x30d   :  { %1659 = vmatprep.subr.bf16.mxu1 %v1658_v15  ;;  %v792_v15 = vld [vmem:[#allocation5 + $0x1f0] sm:$0xff] }
 0x30e   :  { %v483_v17 = vpop.permute.xlu0 %482 }
 0x30f   :  { %v484_v18 = vsel %vm478_vm9, %v483_v17, %v2027_v10  ;;  %v590_v17 = vld [vmem:[#allocation5 + $0x180] sm:$0xff] }
 0x310   :  { %490 = vrot.lane.b32.xlu1 %v484_v18, %s1883_s1  ;;  %v689_v18 = vld [vmem:[#allocation5 + $0xf0] sm:$0xff] }
 0x312   :  { %v486_v19 = vpop.permute.xlu1 %485 }
 0x313   :  { %v487_v20 = vsel %vm478_vm9, %v486_v19, %v2031_v13  ;;  %v1646_v19 = vpack.c.bf16 %v590_v17, %v589_v16  ;;  %v793_v16 = vld [vmem:[#allocation5 + $0x200] sm:$0xff] }
 0x314   :  { %492 = vrot.lane.b32.xlu0 %v487_v20, %s1883_s1  ;;  %v691_v20 = vld [vmem:[#allocation5 + $0x100] sm:$0xff] }
 0x315   :  { %1647 = vmatpush3.bf16.msra.mxu0 %v1646_v19  ;;  %v794_v19 = vld [vmem:[#allocation5 + $0x210] sm:$0xff] }
 0x316   :  { %1648 = vmatprep.subr.bf16.mxu0 %v1887_v1 }
 0x37e   :  { %v489_v21 = vpop.permute.xlu1 %488 }
 0x37f   :  { %v494_v22 = vsel %vm478_vm9, %v489_v21, %v2023_v6  ;;  %v1660_v21 = vpack.c.bf16 %v691_v20, %v689_v18  ;;  %v795_v20 = vld [vmem:[#allocation5 + $0x220] sm:$0xff] }
 0x380   :  { %500 = vrot.lane.b32.xlu1 %v494_v22, %s1889_s2  ;;  %v694_v22 = vld [vmem:[#allocation5 + $0x118] sm:$0xff] }
 0x381   :  { %1661 = vmatpush1.bf16.msra.mxu1 %v1660_v21  ;;  %v812_v21 = vld [vmem:[#allocation5 + $0x330] sm:$0xff] }
 0x382   :  { %v491_v23 = vpop.permute.xlu1 %490 }
 0x383   :  { %v495_v24 = vsel %vm478_vm9, %v491_v23, %v2027_v10  ;;  %v696_v23 = vld [vmem:[#allocation5 + $0x128] sm:$0xff] }
 0x384   :  { %502 = vrot.lane.b32.xlu0 %v495_v24, %s1889_s2  ;;  %v1662_v24 = vpack.c.bf16 %v696_v23, %v694_v22  ;;  %v813_v22 = vld [vmem:[#allocation5 + $0x340] sm:$0xff]  ;;  %v1680_v23 = vpack.c.bf16 %v795_v20, %v794_v19 }
 0x386   :  { %v493_v25 = vpop.permute.xlu0 %492  ;;  %1663 = vmatprep.subr.bf16.mxu1 %v1662_v24 }
 0x387   :  { %v496_v26 = vsel %vm478_vm9, %v493_v25, %v2031_v13  ;;  %v591_v25 = vld [vmem:[#allocation5 + $0x190] sm:$0xff] }
 0x388   :  { %504 = vrot.lane.b32.xlu1 %v496_v26, %s1889_s2  ;;  %v592_v26 = vld [vmem:[#allocation5 + $0x1a0] sm:$0xff] }
 0x3f2   :  { %v501_v27 = vpop.permute.xlu1 %500 }
 0x3f3   :  { %v509_v28 = vmax.f32 %v2023_v6, %v501_v27  ;;  %v693_v27 = vld [vmem:[#allocation5 + $0x110] sm:$0xff] }
 0x3f5   :  { %512 = vrot.lane.b32.xlu0 %v509_v28, %s1883_s1 }
 0x3f6   :  { %v503_v35 = vpop.permute.xlu0 %502 }
 0x3f7   :  { %v510_v36 = vmax.f32 %v2027_v10, %v503_v35  ;;  %v695_v35 = vld [vmem:[#allocation5 + $0x120] sm:$0xff] }
 0x3f9   :  { %515 = vrot.lane.b32.xlu1 %v510_v36, %s1883_s1 }
 0x3fa   :  { %v505_v37 = vpop.permute.xlu1 %504 }
 0x3fb   :  { %v511_v38 = vmax.f32 %v2031_v13, %v505_v37  ;;  %v698_v37 = vld [vmem:[#allocation5 + $0x138] sm:$0xff] }
 0x3fd   :  { %518 = vrot.lane.b32.xlu0 %v511_v38, %s1883_s1 }
 0x467   :  { %v513_v39 = vpop.permute.xlu0 %512 }
 0x468   :  { %v514_v40 = vsel %vm478_vm9, %v513_v39, %v509_v28 }
 0x469   :  { %521 = vrot.lane.b32.xlu1 %v514_v40, %s1883_s1 }
 0x46b   :  { %v516_v41 = vpop.permute.xlu1 %515 }
 0x46c   :  { %v517_v42 = vsel %vm478_vm9, %v516_v41, %v510_v36  ;;  %v593_v41 = vld [vmem:[#allocation5 + $0x1b0] sm:$0xff] }
 0x46d   :  { %523 = vrot.lane.b32.xlu0 %v517_v42, %s1883_s1  ;;  %v594_v42 = vld [vmem:[#allocation5 + $0x1c0] sm:$0xff] }
 0x46f   :  { %v519_v43 = vpop.permute.xlu0 %518 }
 0x470   :  { %v520_v44 = vsel %vm478_vm9, %v519_v43, %v511_v38  ;;  %v697_v43 = vld [vmem:[#allocation5 + $0x130] sm:$0xff] }
 0x471   :  { %525 = vrot.lane.b32.xlu1 %v520_v44, %s1883_s1 }
 0x4db   :  { %v522_v45 = vpop.permute.xlu1 %521 }
 0x4dc   :  { %v527_v46 = vsel %vm478_vm9, %v522_v45, %v509_v28  ;;  %v1652_v45 = vpack.c.bf16 %v594_v42, %v593_v41  ;;  %v817_v41 = vld [vmem:[#allocation5 + $0x380] sm:$0xff] }
 0x4dd   :  { %533 = vrot.lane.b32.xlu0 %v527_v46, %s1890_s22  ;;  %v699_v46 = vld [vmem:[#allocation5 + $0x140] sm:$0xff] }
 0x4df   :  { %v524_v47 = vpop.permute.xlu0 %523 }
 0x4e0   :  { %v528_v48 = vsel %vm478_vm9, %v524_v47, %v510_v36  ;;  %v1668_v47 = vpack.c.bf16 %v699_v46, %v697_v43  ;;  %v818_v46 = vld [vmem:[#allocation5 + $0x390] sm:$0xff] }
 0x4e1   :  { %535 = vrot.lane.b32.xlu1 %v528_v48, %s1890_s22 }
 0x4e3   :  { %v526_v49 = vpop.permute.xlu1 %525 }
 0x4e4   :  { %v529_v50 = vsel %vm478_vm9, %v526_v49, %v511_v38 }
 0x4e5   :  { %537 = vrot.lane.b32.xlu0 %v529_v50, %s1890_s22 }
 0x54f   :  { %v534_v51 = vpop.permute.xlu0 %533 }
 0x550   :  { %v2065_v52 = vmax.f32 %v509_v28, %v534_v51  ;;  %v1649_v28 = vpack.c.bf16 %v592_v26, %v591_v25  ;;  %v1682_v25 = vpack.c.bf16 %v813_v22, %v812_v21  ;;  %v796_v26 = vld [vmem:[#allocation5 + $0x230] sm:$0xff] }
 0x552   :  { %545 = vrot.lane.b32.xlu1 %v2065_v52, %s1883_s1  ;;  %1650 = vmatpush3.bf16.msra.mxu0 %v1649_v28  ;;  %v814_v28 = vld [vmem:[#allocation5 + $0x350] sm:$0xff] }
 0x553   :  { %v536_v53 = vpop.permute.xlu1 %535  ;;  %1651 = vmatprep.subr.bf16.mxu0 %v1887_v1 }
 0x554   :  { %v2069_v54 = vmax.f32 %v510_v36, %v536_v53  ;;  %v1664_v36 = vpack.c.bf16 %v695_v35, %v693_v27  ;;  %v806_v53 = vld [vmem:[#allocation5 + $0x2d0] sm:$0xff]  ;;  %v797_v27 = vld [vmem:[#allocation5 + $0x240] sm:$0xff] }
 0x555   :  { %v815_v35 = vld [vmem:[#allocation5 + $0x360] sm:$0xff] }
 0x556   :  { %548 = vrot.lane.b32.xlu0 %v2069_v54, %s1883_s1  ;;  %1665 = vmatpush1.bf16.msra.mxu1 %v1664_v36  ;;  %v1684_v36 = vpack.c.bf16 %v797_v27, %v796_v26  ;;  %v919_v27 = vld [vmem:[#allocation5 + $0x3f0] sm:$0xff] }
 0x557   :  { %v538_v55 = vpop.permute.xlu0 %537  ;;  %1653 = vmatpush3.bf16.msra.mxu0 %v1652_v45  ;;  %v801_v45 = vld [vmem:[#allocation5 + $0x280] sm:$0xff] }
 0x558   :  { %v2073_v56 = vmax.f32 %v511_v38, %v538_v55  ;;  %v700_v38 = vld [vmem:[#allocation5 + $0x148] sm:$0xff]  ;;  %v807_v55 = vld [vmem:[#allocation5 + $0x2e0] sm:$0xff] }
 0x559   :  { %v1666_v40 = vpack.c.bf16 %v700_v38, %v698_v37  ;;  %v1686_v37 = vpack.c.bf16 %v815_v35, %v814_v28  ;;  %v798_v38 = vld [vmem:[#allocation5 + $0x250] sm:$0xff]  ;;  %v920_v28 = vld [vmem:[#allocation5 + $0x400] sm:$0xff] }
 0x55a   :  { %551 = vrot.lane.b32.xlu1 %v2073_v56, %s1883_s1  ;;  %v1706_v35 = vpack.c.bf16 %v920_v28, %v919_v27 }
 0x55b   :  { %1667 = vmatprep.subr.bf16.mxu1 %v1666_v40  ;;  %v816_v40 = vld [vmem:[#allocation5 + $0x370] sm:$0xff] }
 0x55c   :  { %1669 = vmatpush1.bf16.msra.mxu1 %v1668_v47  ;;  %v1690_v43 = vpack.c.bf16 %v817_v41, %v816_v40  ;;  %v819_v47 = vld [vmem:[#allocation5 + $0x3a0] sm:$0xff] }
 0x55d   :  { %1702 = vmatprep.subr.bf16.mxu1 %v1887_v1 }
 0x5c4   :  { %v546_v57 = vpop.permute.xlu1 %545 }
 0x5c5   :  { %v547_v58 = vsel %vm478_vm9, %v546_v57, %v2065_v52  ;;  %v1670_v57 = vpack.c.bf16 %v807_v55, %v806_v53  ;;  %v820_v55 = vld [vmem:[#allocation5 + $0x3b0] sm:$0xff] }
 0x5c6   :  { %554 = vrot.lane.b32.xlu0 %v547_v58, %s1883_s1 }
 0x5c7   :  { %1671 = vmatprep.subr.bf16.mxu0 %v1670_v57  ;;  %v821_v57 = vld [vmem:[#allocation5 + $0x3c0] sm:$0xff] }
 0x5c8   :  { %v549_v59 = vpop.permute.xlu0 %548 }
 0x5c9   :  { %v550_v60 = vsel %vm478_vm9, %v549_v59, %v2069_v54 }
 0x5ca   :  { %556 = vrot.lane.b32.xlu1 %v550_v60, %s1883_s1 }
 0x5cc   :  { %v552_v61 = vpop.permute.xlu1 %551 }
 0x5cd   :  { %v553_v62 = vsel %vm478_vm9, %v552_v61, %v2073_v56 }
 0x5ce   :  { %558 = vrot.lane.b32.xlu0 %v553_v62, %s1883_s1 }
 0x638   :  { %v555_v39 = vpop.permute.xlu0 %554 }
 0x639   :  { %v560_v44 = vsel %vm478_vm9, %v555_v39, %v2065_v52  ;;  %v799_v39 = vld [vmem:[#allocation5 + $0x260] sm:$0xff] }
 0x63a   :  { %566 = vrot.lane.b32.xlu1 %v560_v44, %s1891_s23  ;;  %v1688_v42 = vpack.c.bf16 %v799_v39, %v798_v38  ;;  %v800_v44 = vld [vmem:[#allocation5 + $0x270] sm:$0xff] }
 0x63c   :  { %v557_v48 = vpop.permute.xlu1 %556 }
 0x63d   :  { %v561_v49 = vsel %vm478_vm9, %v557_v48, %v2069_v54  ;;  %v1692_v48 = vpack.c.bf16 %v801_v45, %v800_v44 }
 0x63e   :  { %568 = vrot.lane.b32.xlu0 %v561_v49, %s1891_s23  ;;  %v1694_v49 = vpack.c.bf16 %v819_v47, %v818_v46 }
 0x640   :  { %v559_v50 = vpop.permute.xlu0 %558 }
 0x641   :  { %v562_v51 = vsel %vm478_vm9, %v559_v50, %v2073_v56  ;;  %v802_v50 = vld [vmem:[#allocation5 + $0x290] sm:$0xff] }
 0x642   :  { %570 = vrot.lane.b32.xlu1 %v562_v51, %s1891_s23  ;;  %v803_v51 = vld [vmem:[#allocation5 + $0x2a0] sm:$0xff] }
 0x643   :  { %v1696_v53 = vpack.c.bf16 %v803_v51, %v802_v50 }
 0x6ac   :  { %v567_v58 = vpop.permute.xlu1 %566 }
 0x6ad   :  { %v575_v59 = vmax.f32 %v2065_v52, %v567_v58  ;;  %v808_v52 = vld [vmem:[#allocation5 + $0x2f0] sm:$0xff]  ;;  %v1698_v58 = vpack.c.bf16 %v821_v57, %v820_v55 }
 0x6af   :  { %v578_v60 = vsub.f32 %v2023_v6, %v575_v59  ;;  %v1672_v6 = vpack.c.bf16 %v791_v11, %v790_v9  ;;  %v804_v59 = vld [vmem:[#allocation5 + $0x2b0] sm:$0xff] }
 0x6b0   :  { %v569_v61 = vpop.permute.xlu0 %568 }
 0x6b1   :  { %v581_v62 = vmul.f32 1.442695, %v578_v60  ;;  %v576_v63 = vmax.f32 %v2069_v54, %v569_v61  ;;  %v1674_v54 = vpack.c.bf16 %v809_v12, %v808_v52  ;;  %v805_v60 = vld [vmem:[#allocation5 + $0x2c0] sm:$0xff] }
 0x6b2   :  { %v1700_v61 = vpack.c.bf16 %v805_v60, %v804_v59 }
 0x6b3   :  { %1761 = vpow2.f32 %v581_v62  ;;  %v579_v2 = vsub.f32 %v2027_v10, %v576_v63  ;;  %v810_v10 = vld [vmem:[#allocation5 + $0x310] sm:$0xff]  ;;  %v918_v63 = vld [vmem:[#allocation5 + $0x3e0] sm:$0xff] }
 0x6b4   :  { %v571_v3 = vpop.permute.xlu1 %570  ;;  %v917_v62 = vld [vmem:[#allocation5 + $0x3d0] sm:$0xff] }
 0x6b5   :  { %v583_v4 = vmul.f32 1.442695, %v579_v2  ;;  %v577_v5 = vmax.f32 %v2073_v56, %v571_v3  ;;  %v811_v56 = vld [vmem:[#allocation5 + $0x320] sm:$0xff]  ;;  %v1703_v2 = vpack.c.bf16 %v918_v63, %v917_v62  ;;  %v72_v3 = vlaneseq }
 0x6b6   :  { %v1678_v18 = vpack.c.bf16 %v811_v56, %v810_v10 }
 0x6b7   :  { %1763 = vpow2.f32 %v583_v4  ;;  %v580_v7 = vsub.f32 %v2031_v13, %v577_v5  ;;  %v1676_v13 = vpack.c.bf16 %v793_v16, %v792_v15  ;;  %v73_v4 = vshrl.u32 %v72_v3, 7 }
 0x6b9   :  { %v585_v8 = vmul.f32 1.442695, %v580_v7  ;;  %v74_v5 = vsub.s32 0, %v73_v4  ;;  %v70_v7 = vld [vmem:[#allocation7] ss:$8 sm:$0x3] }
 0x6bb   :  { %1765 = vpow2.f32 %v585_v8  ;;  %v78_v8 = vsub.s32 1, %v73_v4  ;;  %v75_v9 = vrot.slane %v70_v7, %v74_v5 }
 0x6bd   :  { %v1762_v14 = vpop.eup %1761  ;;  %v79_v11 = vrot.slane %v70_v7, %v78_v8  ;;  %v165_v52 = vadd.f32 %v1994_v29, %v75_v9  ;;  %v171_v56 = vadd.f32 %v1998_v31, %v75_v9 }
 0x6be   :  { %1547 = vmatmul.mubr.msk.f32.vlgmr.msra.gmra.mrb[16].mxu0 %vm595_vm10, %v1762_v14  ;;  %1374 = vmatmul.mubr.msk.f32.vlgmr.msra.gmra.mrb[6].mxu1 %vm595_vm10, %v1762_v14 }
 0x6bf   :  { %1549 = vmatprep.mubr.msk.f32.mxu0 %vm1888_vm0, %v1886_v0  ;;  %771 = vmatprep.mubr.f32.mxu1 %v1886_v0  ;;  %v167_v12 = vadd.f32 %v1996_v30, %v79_v11  ;;  %v177_v30 = vadd.f32 %v2002_v33, %v75_v9  ;;  %v179_v22 = vadd.f32 %v2004_v34, %v79_v11 }
 0x6c0   :  { %1673 = vmatpush3.bf16.msra.mxu0 %v1672_v6  ;;  %1704 = vmatpush3.bf16.msra.mxu1 %v1703_v2 }
 0x6c1   :  { %v1764_v17 = vpop.eup %1763  ;;  %1675 = vmatprep.subr.bf16.mxu0 %v1674_v54  ;;  %1705 = vmatprep.subr.bf16.mxu1 %v1887_v1 }
 0x6c2   :  { %1550 = vmatmul.mubr.msk.f32.gmra.mrb[18].mxu0 %vm595_vm10, %v1764_v17  ;;  %1375 = vmatmul.mubr.msk.f32.gmra.mrb[8].mxu1 %vm595_vm10, %v1764_v17 }
 0x6c3   :  { %1552 = vmatprep.mubr.msk.f32.mxu0 %vm1888_vm0, %v1886_v0  ;;  %777 = vmatprep.mubr.f32.mxu1 %v1886_v0 }
 0x6c4   :  { %1677 = vmatpush3.bf16.msra.mxu0 %v1676_v13  ;;  %v173_v13 = vadd.f32 %v2000_v32, %v79_v11  ;;  %1707 = vmatpush3.bf16.msra.mxu1 %v1706_v35 }
 0x6c5   :  { %v1766_v24 = vpop.eup %1765  ;;  %1679 = vmatprep.subr.bf16.mxu0 %v1678_v18  ;;  %1708 = vmatprep.subr.bf16.mxu1 %v1887_v1 }
 0x6c6   :  { %1553 = vmatmul.mubr.msk.f32.gmra.mrb[20].mxu0 %vm595_vm10, %v1766_v24  ;;  %1376 = vmatmul.mubr.msk.f32.gmra.mrb[10].mxu1 %vm595_vm10, %v1766_v24 }
 0x6c7   :  { %1563 = vmatprep.mubr.msk.f32.mxu1 %vm1888_vm0, %v1886_v0 }
 0x6c8   :  { %1681 = vmatpush3.bf16.msra.mxu0 %v1680_v23 }
 0x6c9   :  { %1683 = vmatprep.subr.bf16.mxu0 %v1682_v25 }
 0x6cc   :  { %1685 = vmatpush3.bf16.msra.mxu0 %v1684_v36 }
 0x6cd   :  { %1687 = vmatprep.subr.bf16.mxu0 %v1686_v37 }
 0x6d0   :  { %1689 = vmatpush3.bf16.msra.mxu0 %v1688_v42 }
 0x6d1   :  { %1691 = vmatprep.subr.bf16.mxu0 %v1690_v43 }
 0x6d4   :  { %1693 = vmatpush3.bf16.msra.mxu0 %v1692_v48 }
 0x6d5   :  { %1695 = vmatprep.subr.bf16.mxu0 %v1694_v49 }
 0x6d8   :  { %1697 = vmatpush3.bf16.msra.mxu0 %v1696_v53 }
 0x6d9   :  { %1699 = vmatprep.subr.bf16.mxu0 %v1698_v58 }
 0x6dc   :  { %1701 = vmatpush3.bf16.msra.mxu0 %v1700_v61  ;;  %v921_v61 = vld [vmem:[#allocation7 + $0x3] ss:$0 sm:$0xff] }
 0x791   :  { %v671_v6 = vpop.f32.mrb[16].mxu0  ;;  %v767_v14 = vpop.f32.mrb[6].mxu1 }
 0x792   :  { %v784_v54 = vmul.f32 %v767_v14, %v165_v52  ;;  %v1548_v15 = vpop.f32.mrb[17].mxu0  ;;  %v769_v16 = vpop.f32.mrb[7].mxu1  ;;  %1767 = vrcp.f32 %v671_v6 }
 0x793   :  { %v785_v10 = vmul.f32 %v769_v16, %v167_v12 }
 0x795   :  { %v676_v17 = vpop.f32.mrb[18].mxu0  ;;  %v773_v18 = vpop.f32.mrb[8].mxu1  ;;  %886 = vmatprep.mubr.f32.mxu0 %v785_v10 }
 0x796   :  { %v786_v19 = vmul.f32 %v773_v18, %v171_v56  ;;  %v1551_v20 = vpop.f32.mrb[19].mxu0  ;;  %v775_v21 = vpop.f32.mrb[9].mxu1  ;;  %887 = vmatmul.mubr.f32.vlgmr.msra.gmra.mrb[22].mxu0 %v784_v54  ;;  %1769 = vrcp.f32 %v676_v17 }
 0x797   :  { %v787_v29 = vmul.f32 %v775_v21, %v173_v13 }
 0x799   :  { %v681_v23 = vpop.f32.mrb[20].mxu0  ;;  %v779_v24 = vpop.f32.mrb[10].mxu1  ;;  %891 = vmatprep.mubr.f32.mxu0 %v787_v29 }
 0x79a   :  { %v788_v25 = vmul.f32 %v779_v24, %v177_v30  ;;  %v1554_v26 = vpop.f32.mrb[21].mxu0  ;;  %v781_v31 = vpop.f32.mrb[11].mxu1  ;;  %892 = vmatmul.mubr.f32.gmra.mrb[24].mxu0 %v786_v19  ;;  %1771 = vrcp.f32 %v681_v23 }
 0x79b   :  { %v789_v32 = vmul.f32 %v781_v31, %v179_v22  ;;  %v1059_v22 = vld [vmem:[#allocation5 + $0x410] sm:$0xff]  ;;  %v1062_v26 = vld [vmem:[#allocation5 + $0x440] sm:$0xff] }
 0x79c   :  { %v1768_v33 = vpop.eup %1767 }
 0x79d   :  { %896 = vmatprep.mubr.f32.mxu0 %v789_v32  ;;  %v905_v34 = vmul.f32 %v1768_v33, %v671_v6 }
 0x79e   :  { %897 = vmatmul.mubr.f32.gmra.mrb[26].mxu0 %v788_v25  ;;  %v1061_v25 = vld [vmem:[#allocation5 + $0x430] sm:$0xff] }
 0x79f   :  { %v908_v37 = vsub.f32 2.0, %v905_v34  ;;  %v1712_v31 = vpack.c.bf16 %v1062_v26, %v1061_v25 }
 0x7a0   :  { %v1770_v36 = vpop.eup %1769 }
 0x7a1   :  { %v906_v38 = vmul.f32 %v1770_v36, %v676_v17  ;;  %v911_v42 = vmul.f32 %v1768_v33, %v908_v37 }
 0x7a3   :  { %v909_v43 = vsub.f32 2.0, %v906_v38 }
 0x7a4   :  { %v1772_v39 = vpop.eup %1771 }
 0x7a5   :  { %v907_v44 = vmul.f32 %v1772_v39, %v681_v23  ;;  %v912_v49 = vmul.f32 %v1770_v36, %v909_v43  ;;  %v1060_v23 = vld [vmem:[#allocation5 + $0x420] sm:$0xff] }
 0x7a6   :  { %v1709_v24 = vpack.c.bf16 %v1060_v23, %v1059_v22  ;;  %v1157_v43 = vld [vmem:[#allocation5 + $0x460] sm:$0xff] }
 0x7a7   :  { %v910_v50 = vsub.f32 2.0, %v907_v44  ;;  %v1012_v44 = vld [vmem:[#allocation7 + $0x5] ss:$0 sm:$0xff] }
 0x7a9   :  { %v913_v58 = vmul.f32 %v1772_v39, %v910_v50  ;;  %v1158_v50 = vld [vmem:[#allocation5 + $0x470] sm:$0xff] }
 0x869   :  { %v1447_v40 = vpop.f32.mrb[22].mxu0 }
 0x86a   :  { %v1448_v41 = vpop.f32.mrb[23].mxu0 }
 0x86b   :  { %v1449_v45 = vadd.f32 %v1448_v41, %v1447_v40  ;;  %v1011_v40 = vld [vmem:[#allocation7 + $0x4] ss:$0 sm:$0xff] }
 0x86d   :  { %v914_v46 = vmul.f32 %v1449_v45, %v911_v42  ;;  %v1450_v47 = vpop.f32.mrb[24].mxu0  ;;  %v1156_v42 = vld [vmem:[#allocation5 + $0x450] sm:$0xff] }
 0x86e   :  { %v1451_v48 = vpop.f32.mrb[25].mxu0 }
 0x86f   :  { %v1452_v51 = vadd.f32 %v1451_v48, %v1450_v47  ;;  %1564 = vmatmul.mubr.msk.f32.vlgmr.msra.gmra.mrb[12].mxu1 %vm91_vm1, %v914_v46  ;;  %v1715_v47 = vpack.c.bf16 %v1157_v43, %v1156_v42 }
 0x870   :  { %1566 = vmatprep.mubr.msk.f32.mxu1 %vm1888_vm0, %v1886_v0  ;;  %1710 = vmatpush3.bf16.msra.mxu1 %v1709_v24 }
 0x871   :  { %v915_v53 = vmul.f32 %v1452_v51, %v912_v49  ;;  %v1453_v55 = vpop.f32.mrb[26].mxu0  ;;  %1711 = vmatprep.subr.bf16.mxu1 %v1887_v1  ;;  %v1159_v51 = vld [vmem:[#allocation5 + $0x480] sm:$0xff] }
 0x872   :  { %v1454_v57 = vpop.f32.mrb[27].mxu0 }
 0x873   :  { %v1455_v59 = vadd.f32 %v1454_v57, %v1453_v55  ;;  %1567 = vmatmul.mubr.msk.f32.gmra.mrb[14].mxu1 %vm91_vm1, %v915_v53  ;;  %v1718_v57 = vpack.c.bf16 %v1159_v51, %v1158_v50 }
 0x874   :  { %1569 = vmatprep.mubr.msk.f32.mxu1 %vm1888_vm0, %v1886_v0  ;;  %1713 = vmatpush3.bf16.msra.mxu1 %v1712_v31 }
 0x875   :  { %v916_v60 = vmul.f32 %v1455_v59, %v913_v58  ;;  %1714 = vmatprep.subr.bf16.mxu1 %v1887_v1 }
 0x877   :  { %1570 = vmatmul.mubr.msk.f32.gmra.mrb[16].mxu1 %vm91_vm1, %v916_v60  ;;  %v1160_v60 = vld [vmem:[#allocation5 + $0x490] sm:$0xff] }
 0x878   :  { %1580 = vmatprep.mubr.msk.f32.mxu1 %vm1888_vm0, %v1886_v0 }
 0x942   :  { %v997_v62 = vpop.f32.mrb[12].mxu1 }
 0x943   :  { %v998_v63 = vadd.f32 %v997_v62, %v921_v61  ;;  %v1565_v2 = vpop.f32.mrb[13].mxu1 }
 0x945   :  { %v1013_v3 = vsel %vm91_vm1, %v998_v63, 0.0 }
 0x946   :  { %1014 = vadd.xlane.f32.xlu0 %v1013_v3  ;;  %v1002_v4 = vpop.f32.mrb[14].mxu1  ;;  %v1162_v3 = vld [vmem:[#allocation5 + $0x4b0] sm:$0xff] }
 0x947   :  { %v1003_v5 = vadd.f32 %v1002_v4, %v921_v61  ;;  %v1568_v7 = vpop.f32.mrb[15].mxu1  ;;  %v1163_v4 = vld [vmem:[#allocation5 + $0x4c0] sm:$0xff] }
 0x948   :  { %v1164_v7 = vld [vmem:[#allocation5 + $0x4d0] sm:$0xff] }
 0x949   :  { %v1016_v8 = vsel %vm91_vm1, %v1003_v5, 0.0 }
 0x94a   :  { %1017 = vadd.xlane.f32.xlu1 %v1016_v8  ;;  %v1007_v9 = vpop.f32.mrb[16].mxu1  ;;  %v1165_v8 = vld [vmem:[#allocation5 + $0x4e0] sm:$0xff] }
 0x94b   :  { %v1008_v11 = vadd.f32 %v1007_v9, %v921_v61  ;;  %v1571_v52 = vpop.f32.mrb[17].mxu1  ;;  %v1161_v61 = vld [vmem:[#allocation5 + $0x4a0] sm:$0xff]  ;;  %v1727_v9 = vpack.c.bf16 %v1165_v8, %v1164_v7 }
 0x94c   :  { %v1167_v52 = vld [vmem:[#allocation5 + $0x500] sm:$0xff] }
 0x94d   :  { %v1019_v12 = vsel %vm91_vm1, %v1008_v11, 0.0 }
 0x94e   :  { %1020 = vadd.xlane.f32.xlu0 %v1019_v12 }
 0x9d3   :  { %v1015_v6 = vpop.xlane.xlu0 %1014 }
 0x9d4   :  { %v1023_v14 = vmul.f32 0.03125, %v1015_v6  ;;  %v1063_v6 = vld [vmem:[#allocation7 + $0x6] ss:$0 sm:$0xff] }
 0x9d6   :  { %v1026_v54 = vsub.f32 %v998_v63, %v1023_v14  ;;  %v1721_v63 = vpack.c.bf16 %v1161_v61, %v1160_v60 }
 0x9d7   :  { %v1018_v15 = vpop.xlane.xlu1 %1017 }
 0x9d8   :  { %v1024_v16 = vmul.f32 0.03125, %v1018_v15  ;;  %v1029_v10 = vmul.f32 %v1026_v54, %v1026_v54 }
 0x9da   :  { %v1027_v56 = vsub.f32 %v1003_v5, %v1024_v16  ;;  %v1032_v13 = vsel %vm91_vm1, %v1029_v10, 0.0  ;;  %v1724_v5 = vpack.c.bf16 %v1163_v4, %v1162_v3  ;;  %v1263_v4 = vld [vmem:[#allocation7 + $0x11] ss:$0 sm:$0xff] }
 0x9db   :  { %1033 = vadd.xlane.f32.xlu0 %v1032_v13  ;;  %v1021_v17 = vpop.xlane.xlu0 %1020 }
 0x9dc   :  { %v1025_v18 = vmul.f32 0.03125, %v1021_v17  ;;  %v1030_v19 = vmul.f32 %v1027_v56, %v1027_v56 }
 0x9de   :  { %v1028_v20 = vsub.f32 %v1008_v11, %v1025_v18  ;;  %v1035_v21 = vsel %vm91_vm1, %v1030_v19, 0.0  ;;  %v1166_v11 = vld [vmem:[#allocation5 + $0x4f0] sm:$0xff] }
 0x9df   :  { %1036 = vadd.xlane.f32.xlu0 %v1035_v21  ;;  %v1730_v12 = vpack.c.bf16 %v1167_v52, %v1166_v11  ;;  %v1168_v21 = vld [vmem:[#allocation7 + $0x7] ss:$0 sm:$0xff] }
 0x9e0   :  { %v1031_v29 = vmul.f32 %v1028_v20, %v1028_v20 }
 0x9e2   :  { %v1038_v30 = vsel %vm91_vm1, %v1031_v29, 0.0 }
 0x9e3   :  { %1039 = vadd.xlane.f32.xlu1 %v1038_v30 }
 0xa68   :  { %v1034_v32 = vpop.xlane.xlu0 %1033 }
 0xa69   :  { %v1041_v27 = vmul.f32 0.03125, %v1034_v32 }
 0xa6b   :  { %v1044_v28 = vadd.f32 1e-05, %v1041_v27 }
 0xa6c   :  { %v1037_v35 = vpop.xlane.xlu0 %1036 }
 0xa6d   :  { %1773 = vrsqrt.f32 %v1044_v28  ;;  %v1042_v33 = vmul.f32 0.03125, %v1037_v35 }
 0xa6f   :  { %v1045_v34 = vadd.f32 1e-05, %v1042_v33 }
 0xa70   :  { %v1040_v36 = vpop.xlane.xlu1 %1039 }
 0xa71   :  { %1775 = vrsqrt.f32 %v1045_v34  ;;  %v1043_v37 = vmul.f32 0.03125, %v1040_v36 }
 0xa73   :  { %v1046_v38 = vadd.f32 1e-05, %v1043_v37 }
 0xa75   :  { %1777 = vrsqrt.f32 %v1046_v38 }
 0xa77   :  { %v1774_v39 = vpop.eup %1773 }
 0xa78   :  { %v1050_v41 = vmul.f32 %v1774_v39, %v1026_v54 }
 0xa7a   :  { %v1053_v45 = vmul.f32 %v1050_v41, %v1011_v40 }
 0xa7b   :  { %v1776_v46 = vpop.eup %1775 }
 0xa7c   :  { %v2144_v48 = vadd.f32 %v1053_v45, %v1012_v44  ;;  %v1051_v49 = vmul.f32 %v1776_v46, %v1027_v56 }
 0xa7e   :  { %1581 = vmatmul.mubr.msk.f32.vlgmr.msra.gmra.mrb[18].mxu1 %vm91_vm1, %v2144_v48  ;;  %v1054_v53 = vmul.f32 %v1051_v49, %v1011_v40 }
 0xa7f   :  { %v1778_v55 = vpop.eup %1777  ;;  %1583 = vmatprep.mubr.msk.f32.mxu1 %vm1888_vm0, %v1886_v0  ;;  %1716 = vmatpush3.bf16.msra.mxu1 %v1715_v47 }
 0xa80   :  { %v1057_v58 = vadd.f32 %v1054_v53, %v1012_v44  ;;  %v1052_v59 = vmul.f32 %v1778_v55, %v1028_v20  ;;  %1717 = vmatprep.subr.bf16.mxu1 %v1887_v1 }
 0xa82   :  { %1584 = vmatmul.mubr.msk.f32.gmra.mrb[20].mxu1 %vm91_vm1, %v1057_v58  ;;  %v1055_v62 = vmul.f32 %v1052_v59, %v1011_v40 }
 0xa83   :  { %1586 = vmatprep.mubr.msk.f32.mxu1 %vm1888_vm0, %v1886_v0  ;;  %1719 = vmatpush3.bf16.msra.mxu1 %v1718_v57 }
 0xa84   :  { %v1058_v2 = vadd.f32 %v1055_v62, %v1012_v44  ;;  %1720 = vmatprep.subr.bf16.mxu1 %v1887_v1 }
 0xa86   :  { %1587 = vmatmul.mubr.msk.f32.gmra.mrb[22].mxu1 %vm91_vm1, %v1058_v2 }
 0xa87   :  { %1722 = vmatpush3.bf16.msra.mxu1 %v1721_v63  ;;  %1613 = vmatprep.mubr.msk.f32.mxu1 %vm1888_vm0, %v1886_v0 }
 0xa88   :  { %1723 = vmatprep.subr.bf16.mxu1 %v1887_v1 }
 0xa8b   :  { %1725 = vmatpush3.bf16.msra.mxu1 %v1724_v5 }
 0xa8c   :  { %1726 = vmatprep.subr.bf16.mxu1 %v1887_v1 }
 0xa8f   :  { %1728 = vmatpush3.bf16.msra.mxu1 %v1727_v9 }
 0xa90   :  { %1729 = vmatprep.subr.bf16.mxu1 %v1887_v1 }
 0xa93   :  { %1731 = vmatpush3.bf16.msra.mxu1 %v1730_v12 }
 0xb51   :  { %v1139_v14 = vpop.f32.mrb[18].mxu1 }
 0xb52   :  { %v1140_v54 = vadd.f32 %v1139_v14, %v1063_v6  ;;  %v1582_v15 = vpop.f32.mrb[19].mxu1 }
 0xb54   :  { %v1153_v16 = vmax.f32 %v1140_v54, 0.0 }
 0xb55   :  { %v1144_v10 = vpop.f32.mrb[20].mxu1 }
 0xb56   :  { %v1145_v56 = vadd.f32 %v1144_v10, %v1063_v6  ;;  %v1585_v13 = vpop.f32.mrb[21].mxu1  ;;  %1614 = vmatmul.mubr.msk.f32.vlgmr.msra.gmra.mrb[24].mxu1 %vm1169_vm11, %v1153_v16 }
 0xb57   :  { %1616 = vmatprep.mubr.msk.f32.mxu1 %vm1888_vm0, %v1886_v0 }
 0xb58   :  { %v1154_v17 = vmax.f32 %v1145_v56, 0.0 }
 0xb59   :  { %v1149_v18 = vpop.f32.mrb[22].mxu1 }
 0xb5a   :  { %v1150_v1 = vadd.f32 %v1149_v18, %v1063_v6  ;;  %v1588_v19 = vpop.f32.mrb[23].mxu1  ;;  %1617 = vmatmul.mubr.msk.f32.gmra.mrb[26].mxu1 %vm1169_vm11, %v1154_v17 }
 0xb5b   :  { %1619 = vmatprep.mubr.msk.f32.mxu1 %vm1888_vm0, %v1886_v0 }
 0xb5c   :  { %v1155_v20 = vmax.f32 %v1150_v1, 0.0 }
 0xb5e   :  { %1620 = vmatmul.mubr.msk.f32.gmra.mrb[28].mxu1 %vm1169_vm11, %v1155_v20 }
 0xc29   :  { %v1245_v29 = vpop.f32.mrb[24].mxu1 }
 0xc2a   :  { %v1246_v30 = vadd.f32 %v1245_v29, %v1168_v21  ;;  %v1615_v22 = vpop.f32.mrb[25].mxu1 }
 0xc2c   :  { %v1259_v23 = vadd.f32 %v1246_v30, %v2144_v48 }
 0xc2d   :  { %v1250_v24 = vpop.f32.mrb[26].mxu1 }
 0xc2e   :  { %v1251_v25 = vadd.f32 %v1250_v24, %v1168_v21  ;;  %v1618_v26 = vpop.f32.mrb[27].mxu1  ;;  %v1264_v31 = vsel %vm91_vm1, %v1259_v23, 0.0 }
 0xc2f   :  { %1265 = vadd.xlane.f32.xlu0 %v1264_v31 }
 0xc30   :  { %v1260_v32 = vadd.f32 %v1251_v25, %v1057_v58 }
 0xc31   :  { %v1255_v27 = vpop.f32.mrb[28].mxu1 }
 0xc32   :  { %v1256_v28 = vadd.f32 %v1255_v27, %v1168_v21  ;;  %v1621_v35 = vpop.f32.mrb[29].mxu1  ;;  %v1267_v0 = vsel %vm91_vm1, %v1260_v32, 0.0 }
 0xc33   :  { %1268 = vadd.xlane.f32.xlu1 %v1267_v0 }
 0xc34   :  { %v1261_v33 = vadd.f32 %v1256_v28, %v1058_v2  ;;  %v1262_v2 = vld [vmem:[#allocation7 + $0x10] ss:$0 sm:$0xff] }
 0xc36   :  { %v1270_v34 = vsel %vm91_vm1, %v1261_v33, 0.0 }
 0xc37   :  { %1271 = vadd.xlane.f32.xlu0 %v1270_v34 }
 0xcbc   :  { %v1266_v36 = vpop.xlane.xlu0 %1265 }
 0xcbd   :  { %v1273_v37 = vmul.f32 0.03125, %v1266_v36 }
 0xcbf   :  { %v1276_v38 = vsub.f32 %v1259_v23, %v1273_v37 }
 0xcc0   :  { %v1269_v39 = vpop.xlane.xlu1 %1268 }
 0xcc1   :  { %v1274_v40 = vmul.f32 0.03125, %v1269_v39  ;;  %v1279_v41 = vmul.f32 %v1276_v38, %v1276_v38 }
 0xcc3   :  { %v1277_v42 = vsub.f32 %v1260_v32, %v1274_v40  ;;  %v1282_v43 = vsel %vm91_vm1, %v1279_v41, 0.0 }
 0xcc4   :  { %1283 = vadd.xlane.f32.xlu1 %v1282_v43  ;;  %v1272_v44 = vpop.xlane.xlu0 %1271 }
 0xcc5   :  { %v1275_v45 = vmul.f32 0.03125, %v1272_v44  ;;  %v1280_v46 = vmul.f32 %v1277_v42, %v1277_v42 }
 0xcc7   :  { %v1278_v47 = vsub.f32 %v1261_v33, %v1275_v45  ;;  %v1285_v48 = vsel %vm91_vm1, %v1280_v46, 0.0 }
 0xcc8   :  { %1286 = vadd.xlane.f32.xlu0 %v1285_v48 }
 0xcc9   :  { %v1281_v49 = vmul.f32 %v1278_v47, %v1278_v47 }
 0xccb   :  { %v1288_v50 = vsel %vm91_vm1, %v1281_v49, 0.0 }
 0xccc   :  { %1289 = vadd.xlane.f32.xlu1 %v1288_v50 }
 0xd51   :  { %v1284_v51 = vpop.xlane.xlu1 %1283 }
 0xd52   :  { %v1291_v53 = vmul.f32 0.03125, %v1284_v51 }
 0xd54   :  { %v1294_v55 = vadd.f32 1e-05, %v1291_v53 }
 0xd55   :  { %v1287_v57 = vpop.xlane.xlu0 %1286 }
 0xd56   :  { %1779 = vrsqrt.f32 %v1294_v55  ;;  %v1292_v58 = vmul.f32 0.03125, %v1287_v57 }
 0xd58   :  { %v1295_v59 = vadd.f32 1e-05, %v1292_v58 }
 0xd59   :  { %v1290_v60 = vpop.xlane.xlu1 %1289 }
 0xd5a   :  { %1781 = vrsqrt.f32 %v1295_v59  ;;  %v1293_v61 = vmul.f32 0.03125, %v1290_v60 }
 0xd5c   :  { %v1296_v62 = vadd.f32 1e-05, %v1293_v61 }
 0xd5e   :  { %1783 = vrsqrt.f32 %v1296_v62 }
 0xd60   :  { %v1780_v63 = vpop.eup %1779 }
 0xd61   :  { %v1300_v3 = vmul.f32 %v1780_v63, %v1276_v38 }
 0xd63   :  { %v1303_v5 = vmul.f32 %v1300_v3, %v1262_v2 }
 0xd64   :  { %v1782_v7 = vpop.eup %1781 }
 0xd65   :  { %v1306_v8 = vadd.f32 %v1303_v5, %v1263_v4  ;;  %v1301_v9 = vmul.f32 %v1782_v7, %v1277_v42 }
 0xd67   :  { %v1312_v11 = vcombine.high %v1306_v8, %v1306_v8  ;;  %v1304_v52 = vmul.f32 %v1301_v9, %v1262_v2  ;;  %1316 = vst.msk [vmem:[#allocation8] sm:$0xf] %vm1315_vm12, %v1306_v8 }
 0xd68   :  { %v1784_v12 = vpop.eup %1783 }
 0xd69   :  { %1317 = vrot.lane.b32.xlu0 %v1312_v11, %s1892_s25  ;;  %v1307_v6 = vadd.f32 %v1304_v52, %v1263_v4  ;;  %v1302_v14 = vmul.f32 %v1784_v12, %v1278_v47 }
 0xd6b   :  { %1322 = vrot.lane.b32.xlu1 %v1307_v6, %s1883_s1  ;;  %v1305_v54 = vmul.f32 %v1302_v14, %v1262_v2  ;;  %v1313_v15 = vcombine.high %v1307_v6, %v1307_v6 }
 0xd6d   :  { %v1308_v16 = vadd.f32 %v1305_v54, %v1263_v4 }
 0xd6f   :  { %1327 = vrot.lane.b32.xlu1 %v1313_v15, %s1891_s23  ;;  %1332 = vst.msk [vmem:[#allocation8 + $0x4] sm:$0xf] %vm1315_vm12, %v1308_v16  ;;  %v1314_v10 = vcombine.high %v1308_v16, %v1308_v16 }
 0xd73   :  { %1333 = vrot.lane.b32.xlu1 %v1314_v10, %s1892_s25 }
 0xddb   :  { %v1318_v56 = vpop.permute.xlu0 %1317 }
 0xddc   :  { %1321 = vst.msk [vmem:[#allocation8] sm:$0xf] %vm1320_vm13, %v1318_v56 }
 0xddd   :  { %v1323_v13 = vpop.permute.xlu1 %1322 }
 0xdde   :  { %1326 = vst.msk [vmem:[#allocation8] sm:$0xf] %vm1325_vm14, %v1323_v13 }
 0xde1   :  { %v1328_v17 = vpop.permute.xlu1 %1327 }
 0xde2   :  { %1331 = vst.msk [vmem:[#allocation8] sm:$0xf] %vm1330_vm15, %v1328_v17 }
 0xde5   :  { %v1334_v18 = vpop.permute.xlu1 %1333 }
 0xde6   :  { %1336 = vst.msk [vmem:[#allocation8 + $0x4] sm:$0xf] %vm1320_vm13, %v1334_v18 }
 0xde7   :  { %1862 = shalt.err (!%p1859_p0)
}
 0xde8   :  { %s1863_s4 = scalar_lea.hbm %s2191_s3, 128 }
 0xde9   :  { %p1864_p1 = scmp.ne.s32.totalorder %s2191_s3, %s1863_s4  ;;  %p1867_p2 = scmp.lt.u32.totalorder %s1863_s4, %s2191_s3 }
 0xdeb   :  { %p1869_p3 = pnand %p1867_p2, %p1864_p1 }
 0xded   :  { %1872 = shalt.err (!%p1869_p3)
}
 0xdee   :  { %1346 = dma.vmem_to_hbm [thread:$0]  %s1344_s27, 128, %s2191_s3, [#allocation4]  }
 0xdef   :  { %1877 = dma.done.wait [#allocation4], 128  }
 0xdf0   :  { %1878 = vsyncadd [#allocation4], 4294967168 }
 0xdf1   :  { %1350 = vsyncpa [#allocation3], 1 }
 0xdf2   :  { %1351 = vsyncpa [#allocation6], 1 }
 0xdf3   :  { %1352 = vsyncpa [#allocation4], 1 }

</bundles_post_ra>
